<compile_context>
chip_gen: v5e
topology: v5e:2x2
jax: 0.10.0
libtpu: 0.0.40
codegen_flags: <defaults>
</compile_context>

<pallas_src>
import functools

import jax
import jax.numpy as jnp
from jax.experimental import pallas as pl
from jax.experimental.pallas import tpu as pltpu

HEADS = 4
IN_CH = 16
HIDDEN = 32           # must be divisible by HEADS
OUT_CH = 16
NEG_SLOPE = 0.2
BIG = 1e30

NODE_TYPES = ("Drug", "Disease")
EDGE_TYPES = (
    ("Drug", "interacts", "Drug"),
    ("Disease", "rev_treats", "Drug"),
    ("Drug", "treats", "Disease"),
    ("Disease", "similar", "Disease"),
)


# ------------------------------ fused kernel --------------------------------

def _fused_han_kernel(
    n_pad,
    x_all_ref,
    wp_drug_ref, bp_drug_ref, wp_dis_ref, bp_dis_ref,
    head_mask_ref,
    attdst_drug_ref, attdst_dis_ref, attsrc_drug_ref, attsrc_dis_ref,
    mask0_ref, mask1_ref, mask2_ref, mask3_ref,
    kw_ref, kb_ref, q_ref, sel_ref,
    wlin_ref, blin_ref, wr_ref, br_ref,
    out_ref,
):
    f32 = jnp.float32
    H = HEADS
    N = n_pad
    HN = H * N

    x_all = x_all_ref[...]                    # (2N, IN_CH): [drug rows; disease rows]
    x_drug = x_all[0:N, :]
    x_dis = x_all[N:2 * N, :]

    # ---- HANConv: per node-type projection (2 matmuls) ----
    h_drug = (jnp.dot(x_drug, wp_drug_ref[...], preferred_element_type=f32)
              + bp_drug_ref[...])
    h_dis = (jnp.dot(x_dis, wp_dis_ref[...], preferred_element_type=f32)
             + bp_dis_ref[...])

    head_mask = head_mask_ref[...]            # (H, HIDDEN) 0/1, hoisted constant

    # Head-masked copies of the projected features stacked along sublanes:
    # row h*N+i = h[i,:] * head_mask[h,:]   (built once per node type, reused).
    hstack_drug = jnp.concatenate(
        [h_drug * head_mask[h:h + 1, :] for h in range(H)], axis=0)   # (HN, C)
    hstack_dis = jnp.concatenate(
        [h_dis * head_mask[h:h + 1, :] for h in range(H)], axis=0)

    # Destination attention logits for BOTH edge types of each dst node type:
    # (HN, 2); column e, row h*N+i = <h_dst[i], att_dst_e>_{head h}.
    cols_drug = jnp.dot(hstack_drug, attdst_drug_ref[...],
                        preferred_element_type=f32)
    cols_dis = jnp.dot(hstack_dis, attdst_dis_ref[...],
                       preferred_element_type=f32)

    # Source attention logits for BOTH edge types of each src node type,
    # already broadcast into stacked-row form: (2*HN, Ns);
    # row e*HN + h*N + i, col j = <h_src[j], att_src_e>_{head h}  (indep. of i).
    srcp_drug = jax.lax.dot_general(attsrc_drug_ref[...], h_drug,
                                    (((1,), (1,)), ((), ())),
                                    preferred_element_type=f32)
    srcp_dis = jax.lax.dot_general(attsrc_dis_ref[...], h_dis,
                                   (((1,), (1,)), ((), ())),
                                   preferred_element_type=f32)

    def edge_attn(col_dst, src_part, mask_t, h_src):
        # col_dst (HN,1), src_part (HN,N), mask_t (HN,N) in {0,1}, h_src (N,C).
        s = col_dst + src_part                                # all heads at once
        s = jnp.maximum(s, NEG_SLOPE * s)                     # leaky relu
        s = s + (mask_t - 1.0) * BIG                          # additive -inf mask
        m = jnp.max(s, axis=-1, keepdims=True)
        p = jnp.exp(s - m) * mask_t
        den = jnp.sum(p, axis=-1, keepdims=True)
        # EUP approximate reciprocal; clamp keeps isolated rows at exact zero.
        attn = p * pl.reciprocal(jnp.maximum(den, 1e-30), approx=True)
        full = jnp.dot(attn, h_src, preferred_element_type=f32)   # (HN, C)
        # merge heads: take head-h channel block from sublane block h
        out = full[0:N, :] * head_mask[0:1, :]
        for h in range(1, H):
            out = out + full[h * N:(h + 1) * N, :] * head_mask[h:h + 1, :]
        return jnp.maximum(out, 0.0)                               # F.relu

    # edge types: 0 Drug-interacts-Drug, 1 Disease-rev_treats-Drug,
    #             2 Drug-treats-Disease, 3 Disease-similar-Disease
    o_d0 = edge_attn(cols_drug[:, 0:1], srcp_drug[0:HN, :], mask0_ref[...], h_drug)
    o_d1 = edge_attn(cols_drug[:, 1:2], srcp_dis[0:HN, :], mask1_ref[...], h_dis)
    o_s0 = edge_attn(cols_dis[:, 0:1], srcp_drug[HN:2 * HN, :], mask2_ref[...], h_drug)
    o_s1 = edge_attn(cols_dis[:, 1:2], srcp_dis[HN:2 * HN, :], mask3_ref[...], h_dis)

    # ---- semantic attention: one k_lin matmul + masked-mean selector matmul ----
    o_stack = jnp.concatenate([o_d0, o_d1, o_s0, o_s1], axis=0)        # (4N, C)
    kst = jnp.tanh(jnp.dot(o_stack, kw_ref[...], preferred_element_type=f32)
                   + kb_ref[...])
    km = jnp.dot(sel_ref[...], kst, preferred_element_type=f32)        # (4, C)
    sc = jnp.sum(q_ref[...] * km, axis=-1, keepdims=True)              # (4, 1)

    def sem_pair(s_a, s_b, o_a, o_b):
        mx = jnp.maximum(s_a, s_b)
        ea = jnp.exp(s_a - mx)
        eb = jnp.exp(s_b - mx)
        inv = pl.reciprocal(ea + eb, approx=False)    # 2 scalars: exact is free
        return (ea * inv) * o_a + (eb * inv) * o_b

    han_drug = sem_pair(sc[0:1, :], sc[1:2, :], o_d0, o_d1)
    han_dis = sem_pair(sc[2:3, :], sc[3:4, :], o_s0, o_s1)

    # ---- output heads (lane-concatenated weights) + shared residual ----
    # han_* is a convex combination of relu outputs => already non-negative,
    # so the module-level relu before the linears is a no-op and is dropped.
    han_all = jnp.concatenate([han_drug, han_dis], axis=0)             # (2N, C)
    lin_all = (jnp.dot(han_all, wlin_ref[...], preferred_element_type=f32)
               + blin_ref[...])                                        # (2N, 2*OUT)
    res_all = jnp.maximum(
        jnp.dot(x_all, wr_ref[...], preferred_element_type=f32) + br_ref[...],
        0.0)                                                           # (2N, OUT)

    out_ref[0:N, :] = lin_all[0:N, 0:OUT_CH] + res_all[0:N, :]
    out_ref[N:2 * N, :] = (lin_all[N:2 * N, OUT_CH:2 * OUT_CH]
                           + res_all[N:2 * N, :])


# ------------------------------ model wrapper -------------------------------

def init_params(key):
    def nrm(k, shape, scale=0.1):
        return (scale * jax.random.normal(k, shape)).astype(jnp.float32)

    keys = iter(jax.random.split(key, 64))
    params = {"proj_w": {}, "proj_b": {}, "att_src": {}, "att_dst": {}}
    for nt in NODE_TYPES:
        params["proj_w"][nt] = nrm(next(keys), (IN_CH, HIDDEN))
        params["proj_b"][nt] = nrm(next(keys), (1, HIDDEN))
    for et in EDGE_TYPES:
        name = "__".join(et)
        params["att_src"][name] = nrm(next(keys), (1, HIDDEN))
        params["att_dst"][name] = nrm(next(keys), (1, HIDDEN))
    params["k_w"] = nrm(next(keys), (HIDDEN, HIDDEN))
    params["k_b"] = nrm(next(keys), (1, HIDDEN))
    params["q"] = nrm(next(keys), (1, HIDDEN))
    params["lin_drug_w"] = nrm(next(keys), (HIDDEN, OUT_CH))
    params["lin_drug_b"] = nrm(next(keys), (1, OUT_CH))
    params["lin_dis_w"] = nrm(next(keys), (HIDDEN, OUT_CH))
    params["lin_dis_b"] = nrm(next(keys), (1, OUT_CH))
    params["res_w"] = nrm(next(keys), (IN_CH, OUT_CH))
    params["res_b"] = nrm(next(keys), (1, OUT_CH))
    return params


def enhanced_han_forward(params, x_dict, masks):
    f32 = jnp.float32
    D = HIDDEN // HEADS
    n_drug = x_dict["Drug"].shape[0]
    n_dis = x_dict["Disease"].shape[0]
    # pad node counts to a sublane multiple so all in-kernel slices/concats are
    # tile-aligned and the output is a single aligned slab
    n_pad = int(-(-max(n_drug, n_dis) // 8) * 8)

    def pad_rows(x, rows):
        return jnp.pad(x.astype(f32), ((0, rows - x.shape[0]), (0, 0)))

    x_all = jnp.concatenate([pad_rows(x_dict["Drug"], n_pad),
                             pad_rows(x_dict["Disease"], n_pad)], axis=0)

    # head -> channel selection mask (HEADS, HIDDEN), passed once to the kernel
    head_mask = (jnp.arange(HIDDEN)[None, :] // D
                 == jnp.arange(HEADS)[:, None]).astype(f32)

    def src_stack(att_vec):          # (1,HIDDEN) -> (HEADS*n_pad, HIDDEN)
        return jnp.repeat(head_mask * att_vec, n_pad, axis=0)

    a_src, a_dst = params["att_src"], params["att_dst"]
    e0, e1, e2, e3 = ("__".join(et) for et in EDGE_TYPES)

    attdst_drug = jnp.concatenate([a_dst[e0].reshape(HIDDEN, 1),
                                   a_dst[e1].reshape(HIDDEN, 1)], axis=1)
    attdst_dis = jnp.concatenate([a_dst[e2].reshape(HIDDEN, 1),
                                  a_dst[e3].reshape(HIDDEN, 1)], axis=1)
    attsrc_drug = jnp.concatenate([src_stack(a_src[e0]), src_stack(a_src[e2])], axis=0)
    attsrc_dis = jnp.concatenate([src_stack(a_src[e1]), src_stack(a_src[e3])], axis=0)

    # dense 0/1 masks, zero-padded to (n_pad,n_pad) and pre-tiled per head
    def tiled_mask(et):
        m = masks[et].astype(f32)
        m = jnp.pad(m, ((0, n_pad - m.shape[0]), (0, n_pad - m.shape[1])))
        return jnp.tile(m, (HEADS, 1))

    mask_t = [tiled_mask(et) for et in EDGE_TYPES]

    # masked-mean selector for the semantic attention (divides by TRUE counts
    # and excludes padded rows): (4 edge-outputs, 4*n_pad rows of o_stack)
    vd = (jnp.arange(n_pad) < n_drug).astype(f32) / n_drug
    vs = (jnp.arange(n_pad) < n_dis).astype(f32) / n_dis
    z = jnp.zeros((n_pad,), f32)
    sel_mean = jnp.stack([
        jnp.concatenate([vd, z, z, z]),
        jnp.concatenate([z, vd, z, z]),
        jnp.concatenate([z, z, vs, z]),
        jnp.concatenate([z, z, z, vs]),
    ], axis=0)

    w_lin_cat = jnp.concatenate([params["lin_drug_w"], params["lin_dis_w"]], axis=1)
    b_lin_cat = jnp.concatenate([params["lin_drug_b"], params["lin_dis_b"]], axis=1)

    args = [
        x_all,
        params["proj_w"]["Drug"], params["proj_b"]["Drug"],
        params["proj_w"]["Disease"], params["proj_b"]["Disease"],
        head_mask,
        attdst_drug, attdst_dis, attsrc_drug, attsrc_dis,
        *mask_t,
        params["k_w"], params["k_b"], params["q"], sel_mean,
        w_lin_cat, b_lin_cat,
        params["res_w"], params["res_b"],
    ]

    vmem = pl.BlockSpec(memory_space=pltpu.MemorySpace.VMEM)
    out_full = pl.pallas_call(
        functools.partial(_fused_han_kernel, n_pad),
        out_shape=jax.ShapeDtypeStruct((2 * n_pad, OUT_CH), f32),
        in_specs=[vmem] * len(args),
        out_specs=vmem,
    )(*args)

    drug_emb = out_full[:n_drug]
    disease_emb = out_full[n_pad:n_pad + n_dis]
    return drug_emb, disease_emb, None


# ------------------------ pure-JAX reference (check) ------------------------

def reference_forward(params, x_dict, masks):
    H, D = HEADS, HIDDEN // HEADS
    proj = {nt: x_dict[nt] @ params["proj_w"][nt] + params["proj_b"][nt]
            for nt in NODE_TYPES}
    out_lists = {nt: [] for nt in NODE_TYPES}
    for et in EDGE_TYPES:
        src, _, dst = et
        name = "__".join(et)
        xs = proj[src].reshape(-1, H, D)
        xd = proj[dst].reshape(-1, H, D)
        a_s = (xs * params["att_src"][name].reshape(1, H, D)).sum(-1)   # (Ns,H)
        a_d = (xd * params["att_dst"][name].reshape(1, H, D)).sum(-1)   # (Nd,H)
        mask = masks[et]
        s = a_d[:, None, :] + a_s[None, :, :]                           # (Nd,Ns,H)
        s = jnp.where(s >= 0, s, NEG_SLOPE * s)
        s = jnp.where(mask[..., None] > 0, s, -1e30)
        m = s.max(axis=1, keepdims=True)
        p = jnp.exp(s - m) * mask[..., None]
        den = p.sum(axis=1, keepdims=True)
        attn = jnp.where(den > 0, p / jnp.maximum(den, 1e-30), 0.0)
        out = jnp.einsum("ijh,jhd->ihd", attn, xs).reshape(mask.shape[0], H * D)
        out_lists[dst].append(jax.nn.relu(out))
    han_out = {}
    for nt in NODE_TYPES:
        stk = jnp.stack(out_lists[nt])                                  # (T,N,C)
        k = jnp.tanh(stk @ params["k_w"] + params["k_b"]).mean(1)       # (T,C)
        sc = (params["q"] * k).sum(-1)                                  # (T,)
        a = jax.nn.softmax(sc)
        han_out[nt] = (a[:, None, None] * stk).sum(0)
    drug = (jax.nn.relu(han_out["Drug"]) @ params["lin_drug_w"]
            + params["lin_drug_b"]
            + jax.nn.relu(x_dict["Drug"] @ params["res_w"] + params["res_b"]))
    disease = (jax.nn.relu(han_out["Disease"]) @ params["lin_dis_w"]
               + params["lin_dis_b"]
               + jax.nn.relu(x_dict["Disease"] @ params["res_w"]
                             + params["res_b"]))
    return drug, disease


# ---------------------------------- main ------------------------------------

def _dense_mask(n_dst, n_src, edge_index):
    src, dst = edge_index
    m = jnp.zeros((n_dst, n_src), jnp.float32)
    return m.at[dst, src].set(1.0)


if __name__ == "__main__":
    key = jax.random.PRNGKey(0)
    k_par, k_xd, k_xs, k_e = jax.random.split(key, 4)

    n_drug, n_disease = 8, 6
    x_dict = {
        "Drug": jax.random.normal(k_xd, (n_drug, IN_CH), jnp.float32),
        "Disease": jax.random.normal(k_xs, (n_disease, IN_CH), jnp.float32),
    }
    n_of = {"Drug": n_drug, "Disease": n_disease}

    # deterministic random edge_index per edge type, converted to dense masks
    masks = {}
    ekeys = jax.random.split(k_e, len(EDGE_TYPES))
    for et, ek in zip(EDGE_TYPES, ekeys):
        src_t, _, dst_t = et
        n_edges = 12
        ks, kd = jax.random.split(ek)
        src_idx = jax.random.randint(ks, (n_edges,), 0, n_of[src_t])
        dst_idx = jax.random.randint(kd, (n_edges,), 0, n_of[dst_t])
        masks[et] = _dense_mask(n_of[dst_t], n_of[src_t], (src_idx, dst_idx))

    params = init_params(k_par)

    drug_emb, disease_emb, _ = enhanced_han_forward(params, x_dict, masks)
    drug_emb = jax.block_until_ready(drug_emb)
    disease_emb = jax.block_until_ready(disease_emb)

    ref_drug, ref_disease = reference_forward(params, x_dict, masks)
    assert drug_emb.shape == (n_drug, OUT_CH)
    assert disease_emb.shape == (n_disease, OUT_CH)
    # tolerance accounts for the EUP approximate reciprocal in the edge softmax
    assert jnp.allclose(drug_emb, ref_drug, atol=5e-3, rtol=1e-2)
    assert jnp.allclose(disease_emb, ref_disease, atol=5e-3, rtol=1e-2)

    print("KERNEL_OK")
</pallas_src>

<mosaic_0001>
module attributes {stable_mosaic.version = 11 : i64} {
  func.func @_fused_han_kernel(%arg0: memref<16x16xf32, #tpu.memory_space<vmem>>, %arg1: memref<16x32xf32, #tpu.memory_space<vmem>>, %arg2: memref<1x32xf32, #tpu.memory_space<vmem>>, %arg3: memref<16x32xf32, #tpu.memory_space<vmem>>, %arg4: memref<1x32xf32, #tpu.memory_space<vmem>>, %arg5: memref<4x32xf32, #tpu.memory_space<vmem>>, %arg6: memref<32x2xf32, #tpu.memory_space<vmem>>, %arg7: memref<32x2xf32, #tpu.memory_space<vmem>>, %arg8: memref<64x32xf32, #tpu.memory_space<vmem>>, %arg9: memref<64x32xf32, #tpu.memory_space<vmem>>, %arg10: memref<32x8xf32, #tpu.memory_space<vmem>>, %arg11: memref<32x8xf32, #tpu.memory_space<vmem>>, %arg12: memref<32x8xf32, #tpu.memory_space<vmem>>, %arg13: memref<32x8xf32, #tpu.memory_space<vmem>>, %arg14: memref<32x32xf32, #tpu.memory_space<vmem>>, %arg15: memref<1x32xf32, #tpu.memory_space<vmem>>, %arg16: memref<1x32xf32, #tpu.memory_space<vmem>>, %arg17: memref<4x32xf32, #tpu.memory_space<vmem>>, %arg18: memref<32x32xf32, #tpu.memory_space<vmem>>, %arg19: memref<1x32xf32, #tpu.memory_space<vmem>>, %arg20: memref<16x16xf32, #tpu.memory_space<vmem>>, %arg21: memref<1x16xf32, #tpu.memory_space<vmem>>, %arg22: memref<16x16xf32, #tpu.memory_space<vmem>>) attributes {dimension_semantics = [], scalar_prefetch = 0 : i64, scratch_operands = 0 : i64, tpu.core_type = #tpu.core_type<tc>} {
    %c0 = arith.constant 0 : index
    %c0_0 = arith.constant 0 : index
    %0 = vector.load %arg0[%c0, %c0_0] : memref<16x16xf32, #tpu.memory_space<vmem>>, vector<16x16xf32>
    %1 = vector.extract_strided_slice %0 {offsets = [0, 0], sizes = [8, 16], strides = [1, 1]} : vector<16x16xf32> to vector<8x16xf32>
    %2 = vector.extract_strided_slice %0 {offsets = [8, 0], sizes = [8, 16], strides = [1, 1]} : vector<16x16xf32> to vector<8x16xf32>
    %c0_1 = arith.constant 0 : index
    %c0_2 = arith.constant 0 : index
    %3 = vector.load %arg1[%c0_1, %c0_2] : memref<16x32xf32, #tpu.memory_space<vmem>>, vector<16x32xf32>
    %cst = arith.constant dense<0.000000e+00> : vector<8x32xf32>
    %4 = tpu.matmul %1, %3, %cst {dimension_numbers = #tpu.dot_dimension_numbers<[1], [0], [0], [1], [0, 0, 1, 1], [], []>} : vector<8x16xf32>, vector<16x32xf32>, vector<8x32xf32> -> vector<8x32xf32>
    %c0_3 = arith.constant 0 : index
    %c0_4 = arith.constant 0 : index
    %5 = vector.load %arg2[%c0_3, %c0_4] : memref<1x32xf32, #tpu.memory_space<vmem>>, vector<1x32xf32>
    %6 = vector.broadcast %5 : vector<1x32xf32> to vector<8x32xf32>
    %7 = arith.addf %4, %6 : vector<8x32xf32>
    %c0_5 = arith.constant 0 : index
    %c0_6 = arith.constant 0 : index
    %8 = vector.load %arg3[%c0_5, %c0_6] : memref<16x32xf32, #tpu.memory_space<vmem>>, vector<16x32xf32>
    %cst_7 = arith.constant dense<0.000000e+00> : vector<8x32xf32>
    %9 = tpu.matmul %2, %8, %cst_7 {dimension_numbers = #tpu.dot_dimension_numbers<[1], [0], [0], [1], [0, 0, 1, 1], [], []>} : vector<8x16xf32>, vector<16x32xf32>, vector<8x32xf32> -> vector<8x32xf32>
    %c0_8 = arith.constant 0 : index
    %c0_9 = arith.constant 0 : index
    %10 = vector.load %arg4[%c0_8, %c0_9] : memref<1x32xf32, #tpu.memory_space<vmem>>, vector<1x32xf32>
    %11 = vector.broadcast %10 : vector<1x32xf32> to vector<8x32xf32>
    %12 = arith.addf %9, %11 : vector<8x32xf32>
    %c0_10 = arith.constant 0 : index
    %c0_11 = arith.constant 0 : index
    %13 = vector.load %arg5[%c0_10, %c0_11] : memref<4x32xf32, #tpu.memory_space<vmem>>, vector<4x32xf32>
    %14 = vector.extract_strided_slice %13 {offsets = [0, 0], sizes = [1, 32], strides = [1, 1]} : vector<4x32xf32> to vector<1x32xf32>
    %15 = vector.broadcast %14 : vector<1x32xf32> to vector<8x32xf32>
    %16 = arith.mulf %7, %15 : vector<8x32xf32>
    %17 = vector.extract_strided_slice %13 {offsets = [1, 0], sizes = [1, 32], strides = [1, 1]} : vector<4x32xf32> to vector<1x32xf32>
    %18 = vector.broadcast %17 : vector<1x32xf32> to vector<8x32xf32>
    %19 = arith.mulf %7, %18 : vector<8x32xf32>
    %20 = vector.extract_strided_slice %13 {offsets = [2, 0], sizes = [1, 32], strides = [1, 1]} : vector<4x32xf32> to vector<1x32xf32>
    %21 = vector.broadcast %20 : vector<1x32xf32> to vector<8x32xf32>
    %22 = arith.mulf %7, %21 : vector<8x32xf32>
    %23 = vector.extract_strided_slice %13 {offsets = [3, 0], sizes = [1, 32], strides = [1, 1]} : vector<4x32xf32> to vector<1x32xf32>
    %24 = vector.broadcast %23 : vector<1x32xf32> to vector<8x32xf32>
    %25 = arith.mulf %7, %24 : vector<8x32xf32>
    %26 = tpu.concatenate %16, %19, %22, %25 in 0 : vector<8x32xf32>, vector<8x32xf32>, vector<8x32xf32>, vector<8x32xf32> -> vector<32x32xf32>
    %27 = vector.extract_strided_slice %13 {offsets = [0, 0], sizes = [1, 32], strides = [1, 1]} : vector<4x32xf32> to vector<1x32xf32>
    %28 = vector.broadcast %27 : vector<1x32xf32> to vector<8x32xf32>
    %29 = arith.mulf %12, %28 : vector<8x32xf32>
    %30 = vector.extract_strided_slice %13 {offsets = [1, 0], sizes = [1, 32], strides = [1, 1]} : vector<4x32xf32> to vector<1x32xf32>
    %31 = vector.broadcast %30 : vector<1x32xf32> to vector<8x32xf32>
    %32 = arith.mulf %12, %31 : vector<8x32xf32>
    %33 = vector.extract_strided_slice %13 {offsets = [2, 0], sizes = [1, 32], strides = [1, 1]} : vector<4x32xf32> to vector<1x32xf32>
    %34 = vector.broadcast %33 : vector<1x32xf32> to vector<8x32xf32>
    %35 = arith.mulf %12, %34 : vector<8x32xf32>
    %36 = vector.extract_strided_slice %13 {offsets = [3, 0], sizes = [1, 32], strides = [1, 1]} : vector<4x32xf32> to vector<1x32xf32>
    %37 = vector.broadcast %36 : vector<1x32xf32> to vector<8x32xf32>
    %38 = arith.mulf %12, %37 : vector<8x32xf32>
    %39 = tpu.concatenate %29, %32, %35, %38 in 0 : vector<8x32xf32>, vector<8x32xf32>, vector<8x32xf32>, vector<8x32xf32> -> vector<32x32xf32>
    %c0_12 = arith.constant 0 : index
    %c0_13 = arith.constant 0 : index
    %40 = vector.load %arg6[%c0_12, %c0_13] : memref<32x2xf32, #tpu.memory_space<vmem>>, vector<32x2xf32>
    %cst_14 = arith.constant dense<0.000000e+00> : vector<32x2xf32>
    %41 = tpu.matmul %26, %40, %cst_14 {dimension_numbers = #tpu.dot_dimension_numbers<[1], [0], [0], [1], [0, 0, 1, 1], [], []>} : vector<32x32xf32>, vector<32x2xf32>, vector<32x2xf32> -> vector<32x2xf32>
    %c0_15 = arith.constant 0 : index
    %c0_16 = arith.constant 0 : index
    %42 = vector.load %arg7[%c0_15, %c0_16] : memref<32x2xf32, #tpu.memory_space<vmem>>, vector<32x2xf32>
    %cst_17 = arith.constant dense<0.000000e+00> : vector<32x2xf32>
    %43 = tpu.matmul %39, %42, %cst_17 {dimension_numbers = #tpu.dot_dimension_numbers<[1], [0], [0], [1], [0, 0, 1, 1], [], []>} : vector<32x32xf32>, vector<32x2xf32>, vector<32x2xf32> -> vector<32x2xf32>
    %c0_18 = arith.constant 0 : index
    %c0_19 = arith.constant 0 : index
    %44 = vector.load %arg8[%c0_18, %c0_19] : memref<64x32xf32, #tpu.memory_space<vmem>>, vector<64x32xf32>
    %cst_20 = arith.constant dense<0.000000e+00> : vector<64x8xf32>
    %45 = tpu.matmul %44, %7, %cst_20 {dimension_numbers = #tpu.dot_dimension_numbers<[1], [1], [0], [0], [0, 0, 1, 0], [], []>} : vector<64x32xf32>, vector<8x32xf32>, vector<64x8xf32> -> vector<64x8xf32>
    %c0_21 = arith.constant 0 : index
    %c0_22 = arith.constant 0 : index
    %46 = vector.load %arg9[%c0_21, %c0_22] : memref<64x32xf32, #tpu.memory_space<vmem>>, vector<64x32xf32>
    %cst_23 = arith.constant dense<0.000000e+00> : vector<64x8xf32>
    %47 = tpu.matmul %46, %12, %cst_23 {dimension_numbers = #tpu.dot_dimension_numbers<[1], [1], [0], [0], [0, 0, 1, 0], [], []>} : vector<64x32xf32>, vector<8x32xf32>, vector<64x8xf32> -> vector<64x8xf32>
    %48 = vector.extract_strided_slice %41 {offsets = [0, 0], sizes = [32, 1], strides = [1, 1]} : vector<32x2xf32> to vector<32x1xf32>
    %49 = vector.extract_strided_slice %45 {offsets = [0, 0], sizes = [32, 8], strides = [1, 1]} : vector<64x8xf32> to vector<32x8xf32>
    %c0_24 = arith.constant 0 : index
    %c0_25 = arith.constant 0 : index
    %50 = vector.load %arg10[%c0_24, %c0_25] : memref<32x8xf32, #tpu.memory_space<vmem>>, vector<32x8xf32>
    %51 = vector.broadcast %48 : vector<32x1xf32> to vector<32x8xf32>
    %52 = arith.addf %51, %49 : vector<32x8xf32>
    %cst_26 = arith.constant 2.000000e-01 : f32
    %53 = vector.broadcast %cst_26 : f32 to vector<32x8xf32>
    %54 = arith.mulf %53, %52 : vector<32x8xf32>
    %55 = arith.maximumf %52, %54 : vector<32x8xf32>
    %cst_27 = arith.constant 1.000000e+00 : f32
    %56 = vector.broadcast %cst_27 : f32 to vector<32x8xf32>
    %57 = arith.subf %50, %56 : vector<32x8xf32>
    %cst_28 = arith.constant 1.000000e+30 : f32
    %58 = vector.broadcast %cst_28 : f32 to vector<32x8xf32>
    %59 = arith.mulf %57, %58 : vector<32x8xf32>
    %60 = arith.addf %55, %59 : vector<32x8xf32>
    %cst_29 = arith.constant dense<0xFF800000> : vector<32xf32>
    %61 = vector.multi_reduction <maximumf>, %60, %cst_29 [1] : vector<32x8xf32> to vector<32xf32>
    %62 = vector.shape_cast %61 : vector<32xf32> to vector<32x1xf32>
    %63 = vector.broadcast %62 : vector<32x1xf32> to vector<32x8xf32>
    %64 = arith.subf %60, %63 : vector<32x8xf32>
    %65 = math.exp %64 : vector<32x8xf32>
    %66 = arith.mulf %65, %50 : vector<32x8xf32>
    %cst_30 = arith.constant dense<0.000000e+00> : vector<32xf32>
    %67 = vector.multi_reduction <add>, %66, %cst_30 [1] : vector<32x8xf32> to vector<32xf32>
    %68 = vector.shape_cast %67 : vector<32xf32> to vector<32x1xf32>
    %cst_31 = arith.constant 1.000000e-30 : f32
    %69 = vector.broadcast %cst_31 : f32 to vector<32x1xf32>
    %70 = arith.maximumf %68, %69 : vector<32x1xf32>
    %71 = tpu.reciprocal %70 {approx = true} : vector<32x1xf32> -> vector<32x1xf32>
    %72 = vector.broadcast %71 : vector<32x1xf32> to vector<32x8xf32>
    %73 = arith.mulf %66, %72 : vector<32x8xf32>
    %cst_32 = arith.constant dense<0.000000e+00> : vector<32x32xf32>
    %74 = tpu.matmul %73, %7, %cst_32 {dimension_numbers = #tpu.dot_dimension_numbers<[1], [0], [0], [1], [0, 0, 1, 1], [], []>} : vector<32x8xf32>, vector<8x32xf32>, vector<32x32xf32> -> vector<32x32xf32>
    %75 = vector.extract_strided_slice %74 {offsets = [0, 0], sizes = [8, 32], strides = [1, 1]} : vector<32x32xf32> to vector<8x32xf32>
    %76 = vector.extract_strided_slice %13 {offsets = [0, 0], sizes = [1, 32], strides = [1, 1]} : vector<4x32xf32> to vector<1x32xf32>
    %77 = vector.broadcast %76 : vector<1x32xf32> to vector<8x32xf32>
    %78 = arith.mulf %75, %77 : vector<8x32xf32>
    %79 = vector.extract_strided_slice %74 {offsets = [8, 0], sizes = [8, 32], strides = [1, 1]} : vector<32x32xf32> to vector<8x32xf32>
    %80 = vector.extract_strided_slice %13 {offsets = [1, 0], sizes = [1, 32], strides = [1, 1]} : vector<4x32xf32> to vector<1x32xf32>
    %81 = vector.broadcast %80 : vector<1x32xf32> to vector<8x32xf32>
    %82 = arith.mulf %79, %81 : vector<8x32xf32>
    %83 = arith.addf %78, %82 : vector<8x32xf32>
    %84 = vector.extract_strided_slice %74 {offsets = [16, 0], sizes = [8, 32], strides = [1, 1]} : vector<32x32xf32> to vector<8x32xf32>
    %85 = vector.extract_strided_slice %13 {offsets = [2, 0], sizes = [1, 32], strides = [1, 1]} : vector<4x32xf32> to vector<1x32xf32>
    %86 = vector.broadcast %85 : vector<1x32xf32> to vector<8x32xf32>
    %87 = arith.mulf %84, %86 : vector<8x32xf32>
    %88 = arith.addf %83, %87 : vector<8x32xf32>
    %89 = vector.extract_strided_slice %74 {offsets = [24, 0], sizes = [8, 32], strides = [1, 1]} : vector<32x32xf32> to vector<8x32xf32>
    %90 = vector.extract_strided_slice %13 {offsets = [3, 0], sizes = [1, 32], strides = [1, 1]} : vector<4x32xf32> to vector<1x32xf32>
    %91 = vector.broadcast %90 : vector<1x32xf32> to vector<8x32xf32>
    %92 = arith.mulf %89, %91 : vector<8x32xf32>
    %93 = arith.addf %88, %92 : vector<8x32xf32>
    %cst_33 = arith.constant 0.000000e+00 : f32
    %94 = vector.broadcast %cst_33 : f32 to vector<8x32xf32>
    %95 = arith.maximumf %93, %94 : vector<8x32xf32>
    %96 = vector.extract_strided_slice %41 {offsets = [0, 1], sizes = [32, 1], strides = [1, 1]} : vector<32x2xf32> to vector<32x1xf32>
    %97 = vector.extract_strided_slice %47 {offsets = [0, 0], sizes = [32, 8], strides = [1, 1]} : vector<64x8xf32> to vector<32x8xf32>
    %c0_34 = arith.constant 0 : index
    %c0_35 = arith.constant 0 : index
    %98 = vector.load %arg11[%c0_34, %c0_35] : memref<32x8xf32, #tpu.memory_space<vmem>>, vector<32x8xf32>
    %99 = vector.broadcast %96 : vector<32x1xf32> to vector<32x8xf32>
    %100 = arith.addf %99, %97 : vector<32x8xf32>
    %cst_36 = arith.constant 2.000000e-01 : f32
    %101 = vector.broadcast %cst_36 : f32 to vector<32x8xf32>
    %102 = arith.mulf %101, %100 : vector<32x8xf32>
    %103 = arith.maximumf %100, %102 : vector<32x8xf32>
    %cst_37 = arith.constant 1.000000e+00 : f32
    %104 = vector.broadcast %cst_37 : f32 to vector<32x8xf32>
    %105 = arith.subf %98, %104 : vector<32x8xf32>
    %cst_38 = arith.constant 1.000000e+30 : f32
    %106 = vector.broadcast %cst_38 : f32 to vector<32x8xf32>
    %107 = arith.mulf %105, %106 : vector<32x8xf32>
    %108 = arith.addf %103, %107 : vector<32x8xf32>
    %cst_39 = arith.constant dense<0xFF800000> : vector<32xf32>
    %109 = vector.multi_reduction <maximumf>, %108, %cst_39 [1] : vector<32x8xf32> to vector<32xf32>
    %110 = vector.shape_cast %109 : vector<32xf32> to vector<32x1xf32>
    %111 = vector.broadcast %110 : vector<32x1xf32> to vector<32x8xf32>
    %112 = arith.subf %108, %111 : vector<32x8xf32>
    %113 = math.exp %112 : vector<32x8xf32>
    %114 = arith.mulf %113, %98 : vector<32x8xf32>
    %cst_40 = arith.constant dense<0.000000e+00> : vector<32xf32>
    %115 = vector.multi_reduction <add>, %114, %cst_40 [1] : vector<32x8xf32> to vector<32xf32>
    %116 = vector.shape_cast %115 : vector<32xf32> to vector<32x1xf32>
    %cst_41 = arith.constant 1.000000e-30 : f32
    %117 = vector.broadcast %cst_41 : f32 to vector<32x1xf32>
    %118 = arith.maximumf %116, %117 : vector<32x1xf32>
    %119 = tpu.reciprocal %118 {approx = true} : vector<32x1xf32> -> vector<32x1xf32>
    %120 = vector.broadcast %119 : vector<32x1xf32> to vector<32x8xf32>
    %121 = arith.mulf %114, %120 : vector<32x8xf32>
    %cst_42 = arith.constant dense<0.000000e+00> : vector<32x32xf32>
    %122 = tpu.matmul %121, %12, %cst_42 {dimension_numbers = #tpu.dot_dimension_numbers<[1], [0], [0], [1], [0, 0, 1, 1], [], []>} : vector<32x8xf32>, vector<8x32xf32>, vector<32x32xf32> -> vector<32x32xf32>
    %123 = vector.extract_strided_slice %122 {offsets = [0, 0], sizes = [8, 32], strides = [1, 1]} : vector<32x32xf32> to vector<8x32xf32>
    %124 = vector.extract_strided_slice %13 {offsets = [0, 0], sizes = [1, 32], strides = [1, 1]} : vector<4x32xf32> to vector<1x32xf32>
    %125 = vector.broadcast %124 : vector<1x32xf32> to vector<8x32xf32>
    %126 = arith.mulf %123, %125 : vector<8x32xf32>
    %127 = vector.extract_strided_slice %122 {offsets = [8, 0], sizes = [8, 32], strides = [1, 1]} : vector<32x32xf32> to vector<8x32xf32>
    %128 = vector.extract_strided_slice %13 {offsets = [1, 0], sizes = [1, 32], strides = [1, 1]} : vector<4x32xf32> to vector<1x32xf32>
    %129 = vector.broadcast %128 : vector<1x32xf32> to vector<8x32xf32>
    %130 = arith.mulf %127, %129 : vector<8x32xf32>
    %131 = arith.addf %126, %130 : vector<8x32xf32>
    %132 = vector.extract_strided_slice %122 {offsets = [16, 0], sizes = [8, 32], strides = [1, 1]} : vector<32x32xf32> to vector<8x32xf32>
    %133 = vector.extract_strided_slice %13 {offsets = [2, 0], sizes = [1, 32], strides = [1, 1]} : vector<4x32xf32> to vector<1x32xf32>
    %134 = vector.broadcast %133 : vector<1x32xf32> to vector<8x32xf32>
    %135 = arith.mulf %132, %134 : vector<8x32xf32>
    %136 = arith.addf %131, %135 : vector<8x32xf32>
    %137 = vector.extract_strided_slice %122 {offsets = [24, 0], sizes = [8, 32], strides = [1, 1]} : vector<32x32xf32> to vector<8x32xf32>
    %138 = vector.extract_strided_slice %13 {offsets = [3, 0], sizes = [1, 32], strides = [1, 1]} : vector<4x32xf32> to vector<1x32xf32>
    %139 = vector.broadcast %138 : vector<1x32xf32> to vector<8x32xf32>
    %140 = arith.mulf %137, %139 : vector<8x32xf32>
    %141 = arith.addf %136, %140 : vector<8x32xf32>
    %cst_43 = arith.constant 0.000000e+00 : f32
    %142 = vector.broadcast %cst_43 : f32 to vector<8x32xf32>
    %143 = arith.maximumf %141, %142 : vector<8x32xf32>
    %144 = vector.extract_strided_slice %43 {offsets = [0, 0], sizes = [32, 1], strides = [1, 1]} : vector<32x2xf32> to vector<32x1xf32>
    %145 = vector.extract_strided_slice %45 {offsets = [32, 0], sizes = [32, 8], strides = [1, 1]} : vector<64x8xf32> to vector<32x8xf32>
    %c0_44 = arith.constant 0 : index
    %c0_45 = arith.constant 0 : index
    %146 = vector.load %arg12[%c0_44, %c0_45] : memref<32x8xf32, #tpu.memory_space<vmem>>, vector<32x8xf32>
    %147 = vector.broadcast %144 : vector<32x1xf32> to vector<32x8xf32>
    %148 = arith.addf %147, %145 : vector<32x8xf32>
    %cst_46 = arith.constant 2.000000e-01 : f32
    %149 = vector.broadcast %cst_46 : f32 to vector<32x8xf32>
    %150 = arith.mulf %149, %148 : vector<32x8xf32>
    %151 = arith.maximumf %148, %150 : vector<32x8xf32>
    %cst_47 = arith.constant 1.000000e+00 : f32
    %152 = vector.broadcast %cst_47 : f32 to vector<32x8xf32>
    %153 = arith.subf %146, %152 : vector<32x8xf32>
    %cst_48 = arith.constant 1.000000e+30 : f32
    %154 = vector.broadcast %cst_48 : f32 to vector<32x8xf32>
    %155 = arith.mulf %153, %154 : vector<32x8xf32>
    %156 = arith.addf %151, %155 : vector<32x8xf32>
    %cst_49 = arith.constant dense<0xFF800000> : vector<32xf32>
    %157 = vector.multi_reduction <maximumf>, %156, %cst_49 [1] : vector<32x8xf32> to vector<32xf32>
    %158 = vector.shape_cast %157 : vector<32xf32> to vector<32x1xf32>
    %159 = vector.broadcast %158 : vector<32x1xf32> to vector<32x8xf32>
    %160 = arith.subf %156, %159 : vector<32x8xf32>
    %161 = math.exp %160 : vector<32x8xf32>
    %162 = arith.mulf %161, %146 : vector<32x8xf32>
    %cst_50 = arith.constant dense<0.000000e+00> : vector<32xf32>
    %163 = vector.multi_reduction <add>, %162, %cst_50 [1] : vector<32x8xf32> to vector<32xf32>
    %164 = vector.shape_cast %163 : vector<32xf32> to vector<32x1xf32>
    %cst_51 = arith.constant 1.000000e-30 : f32
    %165 = vector.broadcast %cst_51 : f32 to vector<32x1xf32>
    %166 = arith.maximumf %164, %165 : vector<32x1xf32>
    %167 = tpu.reciprocal %166 {approx = true} : vector<32x1xf32> -> vector<32x1xf32>
    %168 = vector.broadcast %167 : vector<32x1xf32> to vector<32x8xf32>
    %169 = arith.mulf %162, %168 : vector<32x8xf32>
    %cst_52 = arith.constant dense<0.000000e+00> : vector<32x32xf32>
    %170 = tpu.matmul %169, %7, %cst_52 {dimension_numbers = #tpu.dot_dimension_numbers<[1], [0], [0], [1], [0, 0, 1, 1], [], []>} : vector<32x8xf32>, vector<8x32xf32>, vector<32x32xf32> -> vector<32x32xf32>
    %171 = vector.extract_strided_slice %170 {offsets = [0, 0], sizes = [8, 32], strides = [1, 1]} : vector<32x32xf32> to vector<8x32xf32>
    %172 = vector.extract_strided_slice %13 {offsets = [0, 0], sizes = [1, 32], strides = [1, 1]} : vector<4x32xf32> to vector<1x32xf32>
    %173 = vector.broadcast %172 : vector<1x32xf32> to vector<8x32xf32>
    %174 = arith.mulf %171, %173 : vector<8x32xf32>
    %175 = vector.extract_strided_slice %170 {offsets = [8, 0], sizes = [8, 32], strides = [1, 1]} : vector<32x32xf32> to vector<8x32xf32>
    %176 = vector.extract_strided_slice %13 {offsets = [1, 0], sizes = [1, 32], strides = [1, 1]} : vector<4x32xf32> to vector<1x32xf32>
    %177 = vector.broadcast %176 : vector<1x32xf32> to vector<8x32xf32>
    %178 = arith.mulf %175, %177 : vector<8x32xf32>
    %179 = arith.addf %174, %178 : vector<8x32xf32>
    %180 = vector.extract_strided_slice %170 {offsets = [16, 0], sizes = [8, 32], strides = [1, 1]} : vector<32x32xf32> to vector<8x32xf32>
    %181 = vector.extract_strided_slice %13 {offsets = [2, 0], sizes = [1, 32], strides = [1, 1]} : vector<4x32xf32> to vector<1x32xf32>
    %182 = vector.broadcast %181 : vector<1x32xf32> to vector<8x32xf32>
    %183 = arith.mulf %180, %182 : vector<8x32xf32>
    %184 = arith.addf %179, %183 : vector<8x32xf32>
    %185 = vector.extract_strided_slice %170 {offsets = [24, 0], sizes = [8, 32], strides = [1, 1]} : vector<32x32xf32> to vector<8x32xf32>
    %186 = vector.extract_strided_slice %13 {offsets = [3, 0], sizes = [1, 32], strides = [1, 1]} : vector<4x32xf32> to vector<1x32xf32>
    %187 = vector.broadcast %186 : vector<1x32xf32> to vector<8x32xf32>
    %188 = arith.mulf %185, %187 : vector<8x32xf32>
    %189 = arith.addf %184, %188 : vector<8x32xf32>
    %cst_53 = arith.constant 0.000000e+00 : f32
    %190 = vector.broadcast %cst_53 : f32 to vector<8x32xf32>
    %191 = arith.maximumf %189, %190 : vector<8x32xf32>
    %192 = vector.extract_strided_slice %43 {offsets = [0, 1], sizes = [32, 1], strides = [1, 1]} : vector<32x2xf32> to vector<32x1xf32>
    %193 = vector.extract_strided_slice %47 {offsets = [32, 0], sizes = [32, 8], strides = [1, 1]} : vector<64x8xf32> to vector<32x8xf32>
    %c0_54 = arith.constant 0 : index
    %c0_55 = arith.constant 0 : index
    %194 = vector.load %arg13[%c0_54, %c0_55] : memref<32x8xf32, #tpu.memory_space<vmem>>, vector<32x8xf32>
    %195 = vector.broadcast %192 : vector<32x1xf32> to vector<32x8xf32>
    %196 = arith.addf %195, %193 : vector<32x8xf32>
    %cst_56 = arith.constant 2.000000e-01 : f32
    %197 = vector.broadcast %cst_56 : f32 to vector<32x8xf32>
    %198 = arith.mulf %197, %196 : vector<32x8xf32>
    %199 = arith.maximumf %196, %198 : vector<32x8xf32>
    %cst_57 = arith.constant 1.000000e+00 : f32
    %200 = vector.broadcast %cst_57 : f32 to vector<32x8xf32>
    %201 = arith.subf %194, %200 : vector<32x8xf32>
    %cst_58 = arith.constant 1.000000e+30 : f32
    %202 = vector.broadcast %cst_58 : f32 to vector<32x8xf32>
    %203 = arith.mulf %201, %202 : vector<32x8xf32>
    %204 = arith.addf %199, %203 : vector<32x8xf32>
    %cst_59 = arith.constant dense<0xFF800000> : vector<32xf32>
    %205 = vector.multi_reduction <maximumf>, %204, %cst_59 [1] : vector<32x8xf32> to vector<32xf32>
    %206 = vector.shape_cast %205 : vector<32xf32> to vector<32x1xf32>
    %207 = vector.broadcast %206 : vector<32x1xf32> to vector<32x8xf32>
    %208 = arith.subf %204, %207 : vector<32x8xf32>
    %209 = math.exp %208 : vector<32x8xf32>
    %210 = arith.mulf %209, %194 : vector<32x8xf32>
    %cst_60 = arith.constant dense<0.000000e+00> : vector<32xf32>
    %211 = vector.multi_reduction <add>, %210, %cst_60 [1] : vector<32x8xf32> to vector<32xf32>
    %212 = vector.shape_cast %211 : vector<32xf32> to vector<32x1xf32>
    %cst_61 = arith.constant 1.000000e-30 : f32
    %213 = vector.broadcast %cst_61 : f32 to vector<32x1xf32>
    %214 = arith.maximumf %212, %213 : vector<32x1xf32>
    %215 = tpu.reciprocal %214 {approx = true} : vector<32x1xf32> -> vector<32x1xf32>
    %216 = vector.broadcast %215 : vector<32x1xf32> to vector<32x8xf32>
    %217 = arith.mulf %210, %216 : vector<32x8xf32>
    %cst_62 = arith.constant dense<0.000000e+00> : vector<32x32xf32>
    %218 = tpu.matmul %217, %12, %cst_62 {dimension_numbers = #tpu.dot_dimension_numbers<[1], [0], [0], [1], [0, 0, 1, 1], [], []>} : vector<32x8xf32>, vector<8x32xf32>, vector<32x32xf32> -> vector<32x32xf32>
    %219 = vector.extract_strided_slice %218 {offsets = [0, 0], sizes = [8, 32], strides = [1, 1]} : vector<32x32xf32> to vector<8x32xf32>
    %220 = vector.extract_strided_slice %13 {offsets = [0, 0], sizes = [1, 32], strides = [1, 1]} : vector<4x32xf32> to vector<1x32xf32>
    %221 = vector.broadcast %220 : vector<1x32xf32> to vector<8x32xf32>
    %222 = arith.mulf %219, %221 : vector<8x32xf32>
    %223 = vector.extract_strided_slice %218 {offsets = [8, 0], sizes = [8, 32], strides = [1, 1]} : vector<32x32xf32> to vector<8x32xf32>
    %224 = vector.extract_strided_slice %13 {offsets = [1, 0], sizes = [1, 32], strides = [1, 1]} : vector<4x32xf32> to vector<1x32xf32>
    %225 = vector.broadcast %224 : vector<1x32xf32> to vector<8x32xf32>
    %226 = arith.mulf %223, %225 : vector<8x32xf32>
    %227 = arith.addf %222, %226 : vector<8x32xf32>
    %228 = vector.extract_strided_slice %218 {offsets = [16, 0], sizes = [8, 32], strides = [1, 1]} : vector<32x32xf32> to vector<8x32xf32>
    %229 = vector.extract_strided_slice %13 {offsets = [2, 0], sizes = [1, 32], strides = [1, 1]} : vector<4x32xf32> to vector<1x32xf32>
    %230 = vector.broadcast %229 : vector<1x32xf32> to vector<8x32xf32>
    %231 = arith.mulf %228, %230 : vector<8x32xf32>
    %232 = arith.addf %227, %231 : vector<8x32xf32>
    %233 = vector.extract_strided_slice %218 {offsets = [24, 0], sizes = [8, 32], strides = [1, 1]} : vector<32x32xf32> to vector<8x32xf32>
    %234 = vector.extract_strided_slice %13 {offsets = [3, 0], sizes = [1, 32], strides = [1, 1]} : vector<4x32xf32> to vector<1x32xf32>
    %235 = vector.broadcast %234 : vector<1x32xf32> to vector<8x32xf32>
    %236 = arith.mulf %233, %235 : vector<8x32xf32>
    %237 = arith.addf %232, %236 : vector<8x32xf32>
    %cst_63 = arith.constant 0.000000e+00 : f32
    %238 = vector.broadcast %cst_63 : f32 to vector<8x32xf32>
    %239 = arith.maximumf %237, %238 : vector<8x32xf32>
    %240 = tpu.concatenate %95, %143, %191, %239 in 0 : vector<8x32xf32>, vector<8x32xf32>, vector<8x32xf32>, vector<8x32xf32> -> vector<32x32xf32>
    %c0_64 = arith.constant 0 : index
    %c0_65 = arith.constant 0 : index
    %241 = vector.load %arg14[%c0_64, %c0_65] : memref<32x32xf32, #tpu.memory_space<vmem>>, vector<32x32xf32>
    %cst_66 = arith.constant dense<0.000000e+00> : vector<32x32xf32>
    %242 = tpu.matmul %240, %241, %cst_66 {dimension_numbers = #tpu.dot_dimension_numbers<[1], [0], [0], [1], [0, 0, 1, 1], [], []>} : vector<32x32xf32>, vector<32x32xf32>, vector<32x32xf32> -> vector<32x32xf32>
    %c0_67 = arith.constant 0 : index
    %c0_68 = arith.constant 0 : index
    %243 = vector.load %arg15[%c0_67, %c0_68] : memref<1x32xf32, #tpu.memory_space<vmem>>, vector<1x32xf32>
    %244 = vector.broadcast %243 : vector<1x32xf32> to vector<32x32xf32>
    %245 = arith.addf %242, %244 : vector<32x32xf32>
    %246 = math.tanh %245 : vector<32x32xf32>
    %c0_69 = arith.constant 0 : index
    %c0_70 = arith.constant 0 : index
    %247 = vector.load %arg17[%c0_69, %c0_70] : memref<4x32xf32, #tpu.memory_space<vmem>>, vector<4x32xf32>
    %cst_71 = arith.constant dense<0.000000e+00> : vector<4x32xf32>
    %248 = tpu.matmul %247, %246, %cst_71 {dimension_numbers = #tpu.dot_dimension_numbers<[1], [0], [0], [1], [0, 0, 1, 1], [], []>} : vector<4x32xf32>, vector<32x32xf32>, vector<4x32xf32> -> vector<4x32xf32>
    %c0_72 = arith.constant 0 : index
    %c0_73 = arith.constant 0 : index
    %249 = vector.load %arg16[%c0_72, %c0_73] : memref<1x32xf32, #tpu.memory_space<vmem>>, vector<1x32xf32>
    %250 = vector.broadcast %249 : vector<1x32xf32> to vector<4x32xf32>
    %251 = arith.mulf %250, %248 : vector<4x32xf32>
    %cst_74 = arith.constant dense<0.000000e+00> : vector<4xf32>
    %252 = vector.multi_reduction <add>, %251, %cst_74 [1] : vector<4x32xf32> to vector<4xf32>
    %253 = vector.shape_cast %252 : vector<4xf32> to vector<4x1xf32>
    %254 = vector.extract_strided_slice %253 {offsets = [0, 0], sizes = [1, 1], strides = [1, 1]} : vector<4x1xf32> to vector<1x1xf32>
    %255 = vector.extract_strided_slice %253 {offsets = [1, 0], sizes = [1, 1], strides = [1, 1]} : vector<4x1xf32> to vector<1x1xf32>
    %256 = arith.maximumf %254, %255 : vector<1x1xf32>
    %257 = arith.subf %254, %256 : vector<1x1xf32>
    %258 = math.exp %257 : vector<1x1xf32>
    %259 = arith.subf %255, %256 : vector<1x1xf32>
    %260 = math.exp %259 : vector<1x1xf32>
    %261 = arith.addf %258, %260 : vector<1x1xf32>
    %262 = tpu.reciprocal %261 : vector<1x1xf32> -> vector<1x1xf32>
    %263 = arith.mulf %258, %262 : vector<1x1xf32>
    %264 = vector.broadcast %263 : vector<1x1xf32> to vector<8x32xf32>
    %265 = arith.mulf %264, %95 : vector<8x32xf32>
    %266 = arith.mulf %260, %262 : vector<1x1xf32>
    %267 = vector.broadcast %266 : vector<1x1xf32> to vector<8x32xf32>
    %268 = arith.mulf %267, %143 : vector<8x32xf32>
    %269 = arith.addf %265, %268 : vector<8x32xf32>
    %270 = vector.extract_strided_slice %253 {offsets = [2, 0], sizes = [1, 1], strides = [1, 1]} : vector<4x1xf32> to vector<1x1xf32>
    %271 = vector.extract_strided_slice %253 {offsets = [3, 0], sizes = [1, 1], strides = [1, 1]} : vector<4x1xf32> to vector<1x1xf32>
    %272 = arith.maximumf %270, %271 : vector<1x1xf32>
    %273 = arith.subf %270, %272 : vector<1x1xf32>
    %274 = math.exp %273 : vector<1x1xf32>
    %275 = arith.subf %271, %272 : vector<1x1xf32>
    %276 = math.exp %275 : vector<1x1xf32>
    %277 = arith.addf %274, %276 : vector<1x1xf32>
    %278 = tpu.reciprocal %277 : vector<1x1xf32> -> vector<1x1xf32>
    %279 = arith.mulf %274, %278 : vector<1x1xf32>
    %280 = vector.broadcast %279 : vector<1x1xf32> to vector<8x32xf32>
    %281 = arith.mulf %280, %191 : vector<8x32xf32>
    %282 = arith.mulf %276, %278 : vector<1x1xf32>
    %283 = vector.broadcast %282 : vector<1x1xf32> to vector<8x32xf32>
    %284 = arith.mulf %283, %239 : vector<8x32xf32>
    %285 = arith.addf %281, %284 : vector<8x32xf32>
    %286 = tpu.concatenate %269, %285 in 0 : vector<8x32xf32>, vector<8x32xf32> -> vector<16x32xf32>
    %c0_75 = arith.constant 0 : index
    %c0_76 = arith.constant 0 : index
    %287 = vector.load %arg18[%c0_75, %c0_76] : memref<32x32xf32, #tpu.memory_space<vmem>>, vector<32x32xf32>
    %cst_77 = arith.constant dense<0.000000e+00> : vector<16x32xf32>
    %288 = tpu.matmul %286, %287, %cst_77 {dimension_numbers = #tpu.dot_dimension_numbers<[1], [0], [0], [1], [0, 0, 1, 1], [], []>} : vector<16x32xf32>, vector<32x32xf32>, vector<16x32xf32> -> vector<16x32xf32>
    %c0_78 = arith.constant 0 : index
    %c0_79 = arith.constant 0 : index
    %289 = vector.load %arg19[%c0_78, %c0_79] : memref<1x32xf32, #tpu.memory_space<vmem>>, vector<1x32xf32>
    %290 = vector.broadcast %289 : vector<1x32xf32> to vector<16x32xf32>
    %291 = arith.addf %288, %290 : vector<16x32xf32>
    %c0_80 = arith.constant 0 : index
    %c0_81 = arith.constant 0 : index
    %292 = vector.load %arg20[%c0_80, %c0_81] : memref<16x16xf32, #tpu.memory_space<vmem>>, vector<16x16xf32>
    %cst_82 = arith.constant dense<0.000000e+00> : vector<16x16xf32>
    %293 = tpu.matmul %0, %292, %cst_82 {dimension_numbers = #tpu.dot_dimension_numbers<[1], [0], [0], [1], [0, 0, 1, 1], [], []>} : vector<16x16xf32>, vector<16x16xf32>, vector<16x16xf32> -> vector<16x16xf32>
    %c0_83 = arith.constant 0 : index
    %c0_84 = arith.constant 0 : index
    %294 = vector.load %arg21[%c0_83, %c0_84] : memref<1x16xf32, #tpu.memory_space<vmem>>, vector<1x16xf32>
    %295 = vector.broadcast %294 : vector<1x16xf32> to vector<16x16xf32>
    %296 = arith.addf %293, %295 : vector<16x16xf32>
    %cst_85 = arith.constant 0.000000e+00 : f32
    %297 = vector.broadcast %cst_85 : f32 to vector<16x16xf32>
    %298 = arith.maximumf %296, %297 : vector<16x16xf32>
    %299 = vector.extract_strided_slice %291 {offsets = [0, 0], sizes = [8, 16], strides = [1, 1]} : vector<16x32xf32> to vector<8x16xf32>
    %300 = vector.extract_strided_slice %298 {offsets = [0, 0], sizes = [8, 16], strides = [1, 1]} : vector<16x16xf32> to vector<8x16xf32>
    %301 = arith.addf %299, %300 : vector<8x16xf32>
    %c0_86 = arith.constant 0 : index
    %c0_87 = arith.constant 0 : index
    %302 = vector.load %arg22[%c0_86, %c0_87] : memref<16x16xf32, #tpu.memory_space<vmem>>, vector<8x16xf32>
    tpu.vector_store %arg22[%c0_86, %c0_87], %301 {strides = array<i32>} : memref<16x16xf32, #tpu.memory_space<vmem>>, vector<8x16xf32>,
    %303 = vector.extract_strided_slice %291 {offsets = [8, 16], sizes = [8, 16], strides = [1, 1]} : vector<16x32xf32> to vector<8x16xf32>
    %304 = vector.extract_strided_slice %298 {offsets = [8, 0], sizes = [8, 16], strides = [1, 1]} : vector<16x16xf32> to vector<8x16xf32>
    %305 = arith.addf %303, %304 : vector<8x16xf32>
    %c8 = arith.constant 8 : index
    %c0_88 = arith.constant 0 : index
    %306 = vector.load %arg22[%c8, %c0_88] : memref<16x16xf32, #tpu.memory_space<vmem>>, vector<8x16xf32>
    tpu.vector_store %arg22[%c8, %c0_88], %305 {strides = array<i32>} : memref<16x16xf32, #tpu.memory_space<vmem>>, vector<8x16xf32>,
    return
  }
}

</mosaic_0001>

<bundles_post_ra>
// kernel: tpu_custom_call.1
= control target key start
LH: loop header
LB: loop body
LE: loop exit
PB: predicated region body
PF: predicated region fallthrough
CT: control target
= control target key end

     0   :  { %s2112_s0 = inlined_call_operand.vmem [shape: f32[16,16], index: 0, kind: input, shape index: {}]   ;;  %s2113_s1 = inlined_call_operand.vmem [shape: f32[16,32], index: 1, kind: input, shape index: {}]   ;;  %s2114_s2 = inlined_call_operand.vmem [shape: f32[1,32], index: 2, kind: input, shape index: {}]   ;;  %s2115_s3 = inlined_call_operand.vmem [shape: f32[16,32], index: 3, kind: input, shape index: {}]   ;;  %s2116_s4 = inlined_call_operand.vmem [shape: f32[1,32], index: 4, kind: input, shape index: {}]   ;;  %s2117_s5 = inlined_call_operand.vmem [shape: f32[4,32], index: 5, kind: input, shape index: {}]   ;;  %s2118_s6 = inlined_call_operand.vmem [shape: f32[32,2], index: 6, kind: input, shape index: {}]   ;;  %s2119_s7 = inlined_call_operand.vmem [shape: f32[32,2], index: 7, kind: input, shape index: {}]   ;;  %s2120_s8 = inlined_call_operand.vmem [shape: f32[64,32], index: 8, kind: input, shape index: {}]   ;;  %s2121_s9 = inlined_call_operand.vmem [shape: f32[64,32], index: 9, kind: input, shape index: {}]   ;;  %s2122_s10 = inlined_call_operand.vmem [shape: f32[32,8], index: 10, kind: input, shape index: {}]   ;;  %s2123_s11 = inlined_call_operand.vmem [shape: f32[32,8], index: 11, kind: input, shape index: {}]   ;;  %s2124_s12 = inlined_call_operand.vmem [shape: f32[32,8], index: 12, kind: input, shape index: {}]   ;;  %s2125_s13 = inlined_call_operand.vmem [shape: f32[32,8], index: 13, kind: input, shape index: {}]   ;;  %s2126_s14 = inlined_call_operand.vmem [shape: f32[32,32], index: 14, kind: input, shape index: {}]   ;;  %s2127_s15 = inlined_call_operand.vmem [shape: f32[1,32], index: 15, kind: input, shape index: {}]   ;;  %s2128_s16 = inlined_call_operand.vmem [shape: f32[1,32], index: 16, kind: input, shape index: {}]   ;;  %s2129_s17 = inlined_call_operand.vmem [shape: f32[4,32], index: 17, kind: input, shape index: {}]   ;;  %s2130_s18 = inlined_call_operand.vmem [shape: f32[32,32], index: 18, kind: input, shape index: {}]   ;;  %s2131_s19 = inlined_call_operand.vmem [shape: f32[1,32], index: 19, kind: input, shape index: {}]   ;;  %s2132_s20 = inlined_call_operand.vmem [shape: f32[16,16], index: 20, kind: input, shape index: {}]   ;;  %s2133_s21 = inlined_call_operand.vmem [shape: f32[1,16], index: 21, kind: input, shape index: {}]   ;;  %s2134_s22 = inlined_call_operand.hbm [shape: f32[16,16], index: 22, kind: output, shape index: {}]  }
   0x1   :  { %2139 = sst [smem:[#allocation5_spill]] %s2112_s0 }
   0x2   :  { %2140 = sst [smem:[#allocation6_spill]] %s2113_s1 }
   0x3   :  { %2141 = sst [smem:[#allocation7_spill]] %s2114_s2 }
   0x4   :  { %2142 = sst [smem:[#allocation8_spill]] %s2115_s3 }
   0x5   :  { %2143 = sst [smem:[#allocation9_spill]] %s2116_s4 }
   0x6   :  { %2144 = sst [smem:[#allocation10_spill]] %s2117_s5 }
   0x7   :  { %2145 = sst [smem:[#allocation11_spill]] %s2118_s6 }
   0x8   :  { %2146 = sst [smem:[#allocation12_spill]] %s2128_s16 }
   0x9   :  { %s2147_s29 = sld [smem:[#allocation6_spill]]  ;;  %vm80_vm0 = vcmask 130048  }
   0xa   :  { %s2148_s16 = sld [smem:[#allocation8_spill]] }
   0xb   :  { %s2149_s25 = sld [smem:[#allocation5_spill]] }
   0xc   :  { %s2150_s28 = sld [smem:[#allocation11_spill]] }
   0xf   :  { %v75_v0 = vld [vmem:[%s2147_s29 + $0x8] sm:$0xff]  ;;  %v74_v2 = vld [vmem:[%s2147_s29] sm:$0xff] }
  0x10   :  { %v105_v1 = vld [vmem:[%s2148_s16 + $0x8] sm:$0xff]  ;;  %98 = vmatpush.msra.mxu0 %v75_v0  ;;  %v104_v3 = vld [vmem:[%s2148_s16] sm:$0xff] }
  0x11   :  { %127 = vmatpush.msra.mxu2 %v105_v1  ;;  %v72_v4 = vld [vmem:[%s2149_s25] sm:$0xff]  ;;  %v73_v5 = vld [vmem:[%s2149_s25 + $0x8] sm:$0xff] }
  0x12   :  { %v149_v6 = vld [vmem:[%s2150_s28 + $0x18] sm:$0xff]  ;;  %99 = vmatpush.msra.mxu0 %v74_v2  ;;  %v148_v7 = vld [vmem:[%s2150_s28 + $0x10] sm:$0xff] }
  0x13   :  { %128 = vmatpush.msra.mxu2 %v104_v3  ;;  %1221 = vmatmul.msk.f32.vlgmr.msra.gmra.mxu0 %vm80_vm0, %v72_v4 }
  0x14   :  { %1222 = vmatmul.msk.f32.vlgmr.msra.gmra.mxu2 %vm80_vm0, %v73_v5 }
  0x15   :  { %175 = vmatpush.msrb.mxu2 %v149_v6 }
  0x16   :  { %27 = vsyncpa [#allocation3], 0  ;;  %v147_v8 = vld [vmem:[%s2150_s28 + $0x8] sm:$0xff]  ;;  %v146_v9 = vld [vmem:[%s2150_s28] sm:$0xff]  ;;  %s2151_s30 = sld [smem:[#allocation10_spill]]  ;;  %vm150_vm1 = vcmask 261120  }
  0x17   :  { %176 = vmatpush.msrb.mxu2 %v148_v7  ;;  %v195_v10 = vld [vmem:[%s2119_s7 + $0x18] sm:$0xff]  ;;  %v194_v11 = vld [vmem:[%s2119_s7 + $0x10] sm:$0xff]  ;;  %v193_v12 = vld [vmem:[%s2119_s7 + $0x8] sm:$0xff]  ;;  %s2152_s0 = sld [smem:[#allocation7_spill]]  ;;  %v1428_v34 = vmov 1   ;;  %v1429_v35 = vmov 0  }
  0x18   :  { %220 = vmatpush.msra.mxu3 %v195_v10  ;;  %v192_v13 = vld [vmem:[%s2119_s7] sm:$0xff]  ;;  %s2153_s1 = sld [smem:[#allocation9_spill]]  ;;  %v238_v28 = vld [vmem:[%s2120_s8 + $0x8] sm:$0xff]  ;;  %v239_v33 = vld [vmem:[%s2120_s8 + $0x10] sm:$0xff]  ;;  %1306 = vset.pattern.permute.xlu1 %v1428_v34  ;;  %vm437_vm2 = vcmask 64512   ;;  %vm1060_vm3 = vcmask 257024  }
  0x19   :  { %177 = vmatpush.msrb.mxu2 %v147_v8  ;;  %v237_v21 = vld [vmem:[%s2120_s8] sm:$0xff]  ;;  %v314_v31 = vld [vmem:[%s2121_s9 + $0x8] sm:$0xff]  ;;  %1305 = vset.pattern.permute.xlu0 %v1429_v35  ;;  %v315_v38 = vld [vmem:[%s2121_s9 + $0x10] sm:$0xff]  ;;  %s2154_s6 = sld [smem:[#allocation12_spill]]  ;;  %s1433_s26 = smov 128  }
  0x1a   :  { %221 = vmatpush.msra.mxu3 %v194_v11  ;;  %v313_v26 = vld [vmem:[%s2121_s9] sm:$0xff]  ;;  %1307 = vset.pattern.permute.xlu2 %v1429_v35  ;;  %v240_v40 = vld [vmem:[%s2120_s8 + $0x18] sm:$0xff]  ;;  %v318_v45 = vld [vmem:[%s2121_s9 + $0x28] sm:$0xff]  ;;  %s1434_s2 = smov 8  }
  0x1b   :  { %178 = vmatpush.msrb.mxu2 %v146_v9  ;;  %v316_v42 = vld [vmem:[%s2121_s9 + $0x18] sm:$0xff]  ;;  %v241_v43 = vld [vmem:[%s2120_s8 + $0x20] sm:$0xff]  ;;  %v242_v46 = vld [vmem:[%s2120_s8 + $0x28] sm:$0xff] }
  0x1c   :  { %222 = vmatpush.msra.mxu3 %v193_v12  ;;  %v133_v14 = vld [vmem:[%s2151_s30] sm:$0xf]  ;;  %v243_v47 = vld [vmem:[%s2120_s8 + $0x30] sm:$0xff]  ;;  %v244_v57 = vld [vmem:[%s2120_s8 + $0x38] sm:$0xff] }
  0x1d   :  { %v1316_v15 = vld [vmem:[%s2152_s0] ss:$0 sm:$0xff]  ;;  %v1600_v16 = vperm.slane %v133_v14, 0  ;;  %v1612_v24 = vperm.slane %v133_v14, 1  ;;  %v1627_v29 = vperm.slane %v133_v14, 2  ;;  %v1642_v36 = vperm.slane %v133_v14, 3 }
  0x1e   :  { %223 = vmatpush.msra.mxu3 %v192_v13  ;;  %v1317_v20 = vld [vmem:[%s2153_s1] ss:$0 sm:$0xff]  ;;  %v319_v55 = vld [vmem:[%s2121_s9 + $0x30] sm:$0xff]  ;;  %v1716_v9 = vld [vmem:[%s2122_s10 + $0x8] sm:$0xff] }
  0x1f   :  { %v317_v44 = vld [vmem:[%s2121_s9 + $0x20] sm:$0xff] }
  0x20   :  { %v1702_v58 = vld [vmem:[%s2122_s10] sm:$0xff] }
  0x21   :  { %v1709_v60 = vld [vmem:[%s2123_s11] sm:$0xff]  ;;  %v1249_v63 = vadd.f32 -1.0, %v1702_v58 }
  0x22   :  { %v1257_v0 = vadd.f32 -1.0, %v1709_v60 }
  0x23   :  { %v429_v5 = vmul.f32 1e+30, %v1249_v63 }
  0x24   :  { %v575_v8 = vmul.f32 1e+30, %v1257_v0 }
  0x90   :  { %v101_v17 = vpop.f32.mrf.mxu0 }
  0x91   :  { %v102_v18 = vadd.f32 %v1316_v15, %v101_v17  ;;  %v1250_v17 = vadd.f32 -1.0, %v1716_v9 }
  0x93   :  { %1231 = vmatpush.xpose.msk.msrb.mxu0 %vm150_vm1, %v102_v18  ;;  %517 = vmatpush.msra.mxu2 %v102_v18  ;;  %v135_v19 = vmul.f32 %v1600_v16, %v102_v18  ;;  %v137_v27 = vmul.f32 %v1612_v24, %v102_v18  ;;  %v139_v32 = vmul.f32 %v1627_v29, %v102_v18 }
  0x94   :  { %v141_v39 = vmul.f32 %v1642_v36, %v102_v18 }
  0x95   :  { %1223 = vmatmul.msk.f32.vlgmr.msrb.gmra.mxu2 %vm150_vm1, %v135_v19 }
  0x96   :  { %811 = vmatpush.msrb.mxu2 %v102_v18  ;;  %1232 = vmatmul.msk.f32.vlgmr.msrb.gmra.mxu0 %vm150_vm1, %v237_v21 }
  0x97   :  { %v130_v22 = vpop.f32.mrf.mxu2 }
  0x98   :  { %v131_v23 = vadd.f32 %v1317_v20, %v130_v22 }
  0x9a   :  { %662 = vmatpush.msrb.mxu3 %v131_v23  ;;  %v142_v25 = vmul.f32 %v1600_v16, %v131_v23  ;;  %1240 = vmatpush.xpose.msk.msra.mxu1 %vm150_vm1, %v131_v23  ;;  %v143_v30 = vmul.f32 %v1612_v24, %v131_v23  ;;  %v144_v37 = vmul.f32 %v1627_v29, %v131_v23 }
  0x9b   :  { %v145_v41 = vmul.f32 %v1642_v36, %v131_v23 }
  0x9c   :  { %1227 = vmatmul.msk.f32.vlgmr.msra.gmra.mxu3 %vm150_vm1, %v142_v25  ;;  %v1730_v25 = vld [vmem:[%s2123_s11 + $0x8] sm:$0xff] }
  0x9d   :  { %956 = vmatpush.msra.mxu3 %v131_v23  ;;  %1241 = vmatmul.msk.f32.vlgmr.msra.gmra.mxu1 %vm150_vm1, %v313_v26 }
  0x9e   :  { %1224 = vmatmul.msk.f32.gmra.mxu2 %vm150_vm1, %v137_v27  ;;  %1233 = vmatmul.msk.f32.gmra.mxu0 %vm150_vm1, %v238_v28  ;;  %v430_v27 = vmul.f32 1e+30, %v1250_v17  ;;  %v320_v28 = vld [vmem:[%s2121_s9 + $0x38] sm:$0xff] }
  0xa4   :  { %1228 = vmatmul.msk.f32.gmra.mxu3 %vm150_vm1, %v143_v30 }
  0xa5   :  { %1242 = vmatmul.msk.f32.gmra.mxu1 %vm150_vm1, %v314_v31 }
  0xa6   :  { %1225 = vmatmul.msk.f32.gmra.mxu2 %vm150_vm1, %v139_v32  ;;  %1234 = vmatmul.msk.f32.gmra.mxu0 %vm150_vm1, %v239_v33  ;;  %v1258_v32 = vadd.f32 -1.0, %v1730_v25 }
  0xac   :  { %1229 = vmatmul.msk.f32.gmra.mxu3 %vm150_vm1, %v144_v37 }
  0xad   :  { %1243 = vmatmul.msk.f32.gmra.mxu1 %vm150_vm1, %v315_v38 }
  0xae   :  { %1226 = vmatmul.msk.f32.gmra.mxu2 %vm150_vm1, %v141_v39  ;;  %1235 = vmatmul.msk.f32.gmra.mxu0 %vm150_vm1, %v240_v40  ;;  %v576_v39 = vmul.f32 1e+30, %v1258_v32  ;;  %v1746_v40 = vld [vmem:[%s2122_s10 + $0x10] sm:$0xff] }
  0xb4   :  { %1230 = vmatmul.msk.f32.gmra.mxu3 %vm150_vm1, %v145_v41 }
  0xb5   :  { %1244 = vmatmul.msk.f32.gmra.mxu1 %vm150_vm1, %v316_v42  ;;  %v1251_v42 = vadd.f32 -1.0, %v1746_v40 }
  0xb6   :  { %1236 = vmatmul.msk.f32.gmra.mxu0 %vm150_vm1, %v241_v43 }
  0xbd   :  { %1245 = vmatmul.msk.f32.gmra.mxu1 %vm150_vm1, %v317_v44 }
  0xbe   :  { %1237 = vmatmul.msk.f32.gmra.mxu0 %vm150_vm1, %v242_v46 }
  0xc5   :  { %1246 = vmatmul.msk.f32.gmra.mxu1 %vm150_vm1, %v318_v45 }
  0xc6   :  { %1238 = vmatmul.msk.f32.gmra.mxu0 %vm150_vm1, %v243_v47 }
  0xcd   :  { %1247 = vmatmul.msk.f32.gmra.mxu1 %vm150_vm1, %v319_v55 }
  0xce   :  { %1239 = vmatmul.msk.f32.gmra.mxu0 %vm150_vm1, %v244_v57 }
  0xd5   :  { %1248 = vmatmul.msk.f32.gmra.mxu1 %vm150_vm1, %v320_v28 }
 0x113   :  { %v289_v61 = vpop.f32.mrf.mxu0 }
 0x118   :  { %v180_v48 = vpop.f32.mrf.mxu2 }
 0x119   :  { %544 = vperm.xlu1 %1306, %v180_v48   ;;  %395 = vperm.xlu0 %1305, %v180_v48   ;;  %v431_v48 = vmul.f32 1e+30, %v1251_v42 }
 0x11a   :  { %v365_v62 = vpop.f32.mrf.mxu1 }
 0x11b   :  { %v292_v13 = vpop.f32.mrf.mxu0 }
 0x11f   :  { %v225_v49 = vpop.f32.mrf.mxu3 }
 0x120   :  { %690 = vperm.xlu2 %1307, %v225_v49  }
 0x121   :  { %v183_v50 = vpop.f32.mrf.mxu2  ;;  %1309 = vset.pattern.permute.xlu1 %v1429_v35 }
 0x122   :  { %400 = vperm.xlu0 %1305, %v183_v50   ;;  %v368_v18 = vpop.f32.mrf.mxu1 }
 0x123   :  { %v295_v43 = vpop.f32.mrf.mxu0 }
 0x127   :  { %v228_v51 = vpop.f32.mrf.mxu3 }
 0x128   :  { %1308 = vset.pattern.permute.xlu2 %v1428_v34  ;;  %695 = vperm.xlu1 %1309, %v228_v51  }
 0x129   :  { %838 = vperm.xlu2 %1308, %v225_v49   ;;  %v186_v52 = vpop.f32.mrf.mxu2 }
 0x12a   :  { %1310 = vset.pattern.permute.xlu0 %v1428_v34 }
 0x12b   :  { %552 = vperm.xlu0 %1310, %v186_v52  }
 0x12f   :  { %v1684_v53 = vpop.f32.mrf.mxu3 }
 0x130   :  { %405 = vperm.xlu1 %1309, %v186_v52  }
 0x131   :  { %548 = vperm.xlu2 %1308, %v183_v50   ;;  %v189_v54 = vpop.f32.mrf.mxu2 }
 0x133   :  { %1313 = vset.pattern.permute.xlu0 %v1429_v35 }
 0x137   :  { %v234_v50 = vpop.f32.mrf.mxu3 }
 0x138   :  { %700 = vperm.xlu1 %1309, %v1684_v53  }
 0x139   :  { %842 = vperm.xlu2 %1308, %v228_v51  }
 0x140   :  { %1312 = vset.pattern.permute.xlu1 %v1428_v34 }
 0x141   :  { %1311 = vset.pattern.permute.xlu2 %v1429_v35  ;;  %556 = vperm.xlu1 %1312, %v189_v54  }
 0x142   :  { %410 = vperm.xlu2 %1311, %v189_v54   ;;  %v371_v54 = vpop.f32.mrf.mxu1 }
 0x14a   :  { %1314 = vset.pattern.permute.xlu2 %v1428_v34  ;;  %v1759_v57 = vpop.f32.mrf.mxu1 }
 0x17a   :  { %v1693_v56 = vpop.permute.xlu2 %690 }
 0x183   :  { %v1704_v59 = vpop.permute.xlu2 %838 }
 0x18b   :  { %v545_v1 = vpop.permute.xlu1 %544  ;;  %v396_v2 = vpop.permute.xlu0 %395 }
 0x18c   :  { %v559_v3 = vadd.f32 %v545_v1, %v365_v62  ;;  %v413_v4 = vadd.f32 %v396_v2, %v289_v61  ;;  %v549_v12 = vpop.permute.xlu2 %548  ;;  %v298_v62 = vpop.f32.mrf.mxu0  ;;  %v1764_v1 = vld [vmem:[%s2123_s11 + $0x10] sm:$0xff] }
 0x18d   :  { %v560_v20 = vadd.f32 %v549_v12, %v368_v18  ;;  %v1777_v12 = vld [vmem:[%s2125_s13] sm:$0xff] }
 0x18e   :  { %v563_v6 = vmul.f32 0.2, %v559_v3  ;;  %v417_v7 = vmul.f32 0.2, %v413_v4 }
 0x18f   :  { %v564_v30 = vmul.f32 0.2, %v560_v20 }
 0x190   :  { %v567_v10 = vmax.f32 %v559_v3, %v563_v6  ;;  %v421_v11 = vmax.f32 %v413_v4, %v417_v7  ;;  %v377_v4 = vpop.f32.mrf.mxu1 }
 0x191   :  { %v568_v37 = vmax.f32 %v560_v20, %v564_v30 }
 0x192   :  { %v1718_v14 = vadd.f32 %v429_v5, %v421_v11  ;;  %v1720_v15 = vadd.f32 %v575_v8, %v567_v10  ;;  %v853_v8 = vadd.f32 %v1704_v59, %v377_v4  ;;  %v1786_v59 = vld [vmem:[%s2124_s12] sm:$0xff]  ;;  %v1821_v4 = vld [vmem:[%s2124_s12 + $0x10] sm:$0xff] }
 0x193   :  { %v1748_v41 = vadd.f32 %v576_v39, %v568_v37 }
 0x194   :  { %v401_v19 = vpop.permute.xlu0 %400  ;;  %v438_v22 = vsel %vm437_vm2, %v1718_v14, -inf  ;;  %v583_v23 = vsel %vm437_vm2, %v1720_v15, -inf  ;;  %v843_v55 = vpop.permute.xlu2 %842 }
 0x195   :  { %v414_v21 = vadd.f32 %v401_v19, %v292_v13  ;;  %439 = vmax.xlane.f32.xlu0 %v438_v22  ;;  %584 = vmax.xlane.f32.xlu2 %v583_v23  ;;  %v586_v47 = vsel %vm437_vm2, %v1748_v41, -inf  ;;  %v301_v7 = vpop.f32.mrf.mxu0  ;;  %v857_v19 = vmul.f32 0.2, %v853_v8 }
 0x196   :  { %v708_v13 = vadd.f32 %v1693_v56, %v301_v7 }
 0x197   :  { %v418_v26 = vmul.f32 0.2, %v414_v21  ;;  %v861_v28 = vmax.f32 %v853_v8, %v857_v19 }
 0x198   :  { %v380_v22 = vpop.f32.mrf.mxu1  ;;  %v712_v23 = vmul.f32 0.2, %v708_v13 }
 0x199   :  { %v422_v31 = vmax.f32 %v414_v21, %v418_v26  ;;  %v1273_v21 = vadd.f32 -1.0, %v1777_v12  ;;  %v854_v56 = vadd.f32 %v843_v55, %v380_v22 }
 0x19a   :  { %v1737_v33 = vpop.permute.xlu1 %695  ;;  %v716_v39 = vmax.f32 %v708_v13, %v712_v23 }
 0x19b   :  { %v1739_v35 = vadd.f32 %v430_v27, %v422_v31  ;;  %v1265_v27 = vadd.f32 -1.0, %v1786_v59  ;;  %v869_v37 = vmul.f32 1e+30, %v1273_v21 }
 0x19c   :  { %v411_v63 = vpop.permute.xlu2 %410 }
 0x19d   :  { %v441_v38 = vsel %vm437_vm2, %v1739_v35, -inf  ;;  %v553_v61 = vpop.permute.xlu0 %552  ;;  %v416_v2 = vadd.f32 %v411_v63, %v298_v62  ;;  %v304_v30 = vpop.f32.mrf.mxu0 }
 0x19e   :  { %442 = vmax.xlane.f32.xlu1 %v441_v38  ;;  %v561_v0 = vadd.f32 %v553_v61, %v371_v54  ;;  %v1796_v38 = vld [vmem:[%s2125_s13 + $0x8] sm:$0xff]  ;;  %v709_v42 = vadd.f32 %v1737_v33, %v304_v30 }
 0x19f   :  { %v420_v5 = vmul.f32 0.2, %v416_v2 }
 0x1a0   :  { %v565_v3 = vmul.f32 0.2, %v561_v0 }
 0x1a1   :  { %v424_v17 = vmax.f32 %v416_v2, %v420_v5 }
 0x1a2   :  { %v406_v44 = vpop.permute.xlu1 %405  ;;  %v569_v10 = vmax.f32 %v561_v0, %v565_v3 }
 0x1a3   :  { %v415_v45 = vadd.f32 %v406_v44, %v295_v43  ;;  %v724_v44 = vmul.f32 1e+30, %v1265_v27 }
 0x1a5   :  { %v419_v46 = vmul.f32 0.2, %v415_v45  ;;  %v307_v54 = vpop.f32.mrf.mxu0 }
 0x1a6   :  { %587 = vmax.xlane.f32.xlu1 %v586_v47  ;;  %v1274_v47 = vadd.f32 -1.0, %v1796_v38 }
 0x1a7   :  { %v423_v49 = vmax.f32 %v415_v45, %v419_v46  ;;  %v858_v45 = vmul.f32 0.2, %v854_v56  ;;  %v1801_v46 = vadd.f32 %v869_v37, %v861_v28 }
 0x1a8   :  { %v870_v61 = vmul.f32 1e+30, %v1274_v47 }
 0x1a9   :  { %v1753_v51 = vadd.f32 %v431_v48, %v423_v49  ;;  %705 = vperm.xlu0 %1313, %v234_v50   ;;  %v1807_v48 = vld [vmem:[%s2124_s12 + $0x8] sm:$0xff]  ;;  %v713_v49 = vmul.f32 0.2, %v709_v42  ;;  %v877_v55 = vsel %vm437_vm2, %v1801_v46, -inf }
 0x1aa   :  { %v701_v31 = vpop.permute.xlu1 %700  ;;  %v1266_v33 = vadd.f32 -1.0, %v1807_v48 }
 0x1ab   :  { %v444_v52 = vsel %vm437_vm2, %v1753_v51, -inf  ;;  %v717_v63 = vmax.f32 %v709_v42, %v713_v49  ;;  %v710_v0 = vadd.f32 %v701_v31, %v307_v54  ;;  %v383_v42 = vpop.f32.mrf.mxu1 }
 0x1ac   :  { %v725_v3 = vmul.f32 1e+30, %v1266_v33 }
 0x1ad   :  { %846 = vperm.xlu2 %1314, %v1684_v53   ;;  %v1259_v53 = vadd.f32 -1.0, %v1764_v1  ;;  %v714_v7 = vmul.f32 0.2, %v710_v0 }
 0x1ae   :  { %445 = vmax.xlane.f32.xlu1 %v444_v52  ;;  %v862_v52 = vmax.f32 %v854_v56, %v858_v45  ;;  %v1829_v8 = vadd.f32 %v725_v3, %v717_v63  ;;  %v310_v3 = vpop.f32.mrf.mxu0 }
 0x1af   :  { %v577_v11 = vmul.f32 1e+30, %v1259_v53 }
 0x1b0   :  { %v1816_v53 = vadd.f32 %v870_v61, %v862_v52 }
 0x1b1   :  { %1315 = vset.pattern.permute.xlu0 %v1428_v34  ;;  %v1770_v34 = vld [vmem:[%s2122_s10 + $0x18] sm:$0xff]  ;;  %v1780_v20 = vadd.f32 %v577_v11, %v569_v10  ;;  %v1267_v10 = vadd.f32 -1.0, %v1821_v4 }
 0x1b2   :  { %v1252_v6 = vadd.f32 -1.0, %v1770_v34  ;;  %v880_v11 = vsel %vm437_vm2, %v1816_v53, -inf }
 0x1b3   :  { %v589_v32 = vsel %vm437_vm2, %v1780_v20, -inf  ;;  %v557_v62 = vpop.permute.xlu1 %556  ;;  %v726_v19 = vmul.f32 1e+30, %v1267_v10 }
 0x1b4   :  { %v432_v18 = vmul.f32 1e+30, %v1252_v6  ;;  %v562_v5 = vadd.f32 %v557_v62, %v1759_v57  ;;  %v1827_v6 = vld [vmem:[%s2123_s11 + $0x18] sm:$0xff]  ;;  %v735_v57 = vsel %vm437_vm2, %v1829_v8, -inf }
 0x1b6   :  { %v1788_v26 = vadd.f32 %v432_v18, %v424_v17  ;;  %v566_v13 = vmul.f32 0.2, %v562_v5  ;;  %v1260_v17 = vadd.f32 -1.0, %v1827_v6  ;;  %v718_v18 = vmax.f32 %v710_v0, %v714_v7 }
 0x1b8   :  { %v447_v43 = vsel %vm437_vm2, %v1788_v26, -inf  ;;  %v570_v21 = vmax.f32 %v562_v5, %v566_v13  ;;  %v578_v22 = vmul.f32 1e+30, %v1260_v17  ;;  %v1837_v23 = vadd.f32 %v726_v19, %v718_v18 }
 0x1ba   :  { %v1839_v27 = vadd.f32 %v578_v22, %v570_v21  ;;  %v738_v28 = vsel %vm437_vm2, %v1837_v23, -inf }
 0x1bc   :  { %v592_v56 = vsel %vm437_vm2, %v1839_v27, -inf }
 0x1c7   :  { %850 = vperm.xlu1 %1312, %v234_v50   ;;  %v1809_v50 = vadd.f32 %v724_v44, %v716_v39  ;;  %v1849_v39 = vld [vmem:[%s2125_s13 + $0x10] sm:$0xff] }
 0x1c9   :  { %v732_v2 = vsel %vm437_vm2, %v1809_v50, -inf }
 0x1d3   :  { %590 = vmax.xlane.f32.xlu0 %v589_v32 }
 0x1d6   :  { %448 = vmax.xlane.f32.xlu2 %v447_v43  ;;  %v1275_v43 = vadd.f32 -1.0, %v1849_v39 }
 0x1db   :  { %878 = vmax.xlane.f32.xlu0 %v877_v55  ;;  %v871_v55 = vmul.f32 1e+30, %v1275_v43 }
 0x1de   :  { %733 = vmax.xlane.f32.xlu2 %v732_v2 }
 0x1e3   :  { %881 = vmax.xlane.f32.xlu0 %v880_v11 }
 0x1e6   :  { %736 = vmax.xlane.f32.xlu2 %v735_v57 }
 0x1ee   :  { %739 = vmax.xlane.f32.xlu2 %v738_v28 }
 0x1f1   :  { %593 = vmax.xlane.f32.xlu1 %v592_v56 }
 0x208   :  { %v440_v30 = vpop.xlane.xlu0 %439  ;;  %v585_v31 = vpop.xlane.xlu2 %584 }
 0x209   :  { %v450_v32 = vsub.f32 %v1718_v14, %v440_v30  ;;  %v595_v63 = vsub.f32 %v1720_v15, %v585_v31 }
 0x20b   :  { %v454_v37 = vmul.f32 1.442695, %v450_v32  ;;  %v599_v10 = vmul.f32 1.442695, %v595_v63 }
 0x20d   :  { %1322 = vpow2.f32 %v454_v37 }
 0x210   :  { %v847_v45 = vpop.permute.xlu2 %846 }
 0x211   :  { %v443_v44 = vpop.xlane.xlu1 %442  ;;  %v855_v49 = vadd.f32 %v847_v45, %v383_v42 }
 0x212   :  { %v451_v47 = vsub.f32 %v1739_v35, %v443_v44  ;;  %v1864_v35 = vld [vmem:[%s2124_s12 + $0x18] sm:$0xff] }
 0x213   :  { %v1323_v33 = vpop.eup %1322  ;;  %v859_v54 = vmul.f32 0.2, %v855_v49  ;;  %v1268_v5 = vadd.f32 -1.0, %v1864_v35 }
 0x214   :  { %v456_v52 = vmul.f32 1.442695, %v451_v47  ;;  %v1854_v14 = vmul.f32 %v1323_v33, %v1702_v58  ;;  %v1898_v47 = vld [vmem:[%s2125_s13 + $0x18] sm:$0xff] }
 0x215   :  { %v863_v61 = vmax.f32 %v855_v49, %v859_v54  ;;  %v727_v57 = vmul.f32 1e+30, %v1268_v5  ;;  %v1276_v49 = vadd.f32 -1.0, %v1898_v47 }
 0x216   :  { %1324 = vpow2.f32 %v456_v52  ;;  %v466_v62 = vsel %vm437_vm2, %v1854_v14, 0.0 }
 0x217   :  { %467 = vadd.xlane.f32.xlu1 %v466_v62  ;;  %v1859_v0 = vadd.f32 %v871_v55, %v863_v61  ;;  %1326 = vpow2.f32 %v599_v10  ;;  %v872_v55 = vmul.f32 1e+30, %v1276_v49 }
 0x219   :  { %v588_v2 = vpop.xlane.xlu1 %587  ;;  %v883_v58 = vsel %vm437_vm2, %v1859_v0, -inf }
 0x21a   :  { %884 = vmax.xlane.f32.xlu0 %v883_v58  ;;  %v596_v19 = vsub.f32 %v1748_v41, %v588_v2 }
 0x21b   :  { %v706_v11 = vpop.permute.xlu0 %705 }
 0x21c   :  { %v1325_v7 = vpop.eup %1324  ;;  %v711_v15 = vadd.f32 %v706_v11, %v310_v3  ;;  %v601_v30 = vmul.f32 1.442695, %v596_v19 }
 0x21d   :  { %v1870_v13 = vmul.f32 %v1325_v7, %v1716_v9  ;;  %v1327_v32 = vpop.eup %1326 }
 0x21e   :  { %v715_v17 = vmul.f32 0.2, %v711_v15  ;;  %v1881_v37 = vmul.f32 %v1327_v32, %v1709_v60 }
 0x21f   :  { %v469_v18 = vsel %vm437_vm2, %v1870_v13, 0.0 }
 0x220   :  { %470 = vadd.xlane.f32.xlu1 %v469_v18  ;;  %v719_v21 = vmax.f32 %v711_v15, %v715_v17  ;;  %v611_v42 = vsel %vm437_vm2, %v1881_v37, 0.0 }
 0x221   :  { %v446_v22 = vpop.xlane.xlu1 %445 }
 0x222   :  { %v452_v28 = vsub.f32 %v1753_v51, %v446_v22  ;;  %v1876_v56 = vadd.f32 %v727_v57, %v719_v21 }
 0x224   :  { %v458_v31 = vmul.f32 1.442695, %v452_v28  ;;  %v741_v9 = vsel %vm437_vm2, %v1876_v56, -inf }
 0x225   :  { %742 = vmax.xlane.f32.xlu2 %v741_v9 }
 0x226   :  { %1328 = vpow2.f32 %v458_v31 }
 0x227   :  { %1330 = vpow2.f32 %v601_v30 }
 0x22c   :  { %v1329_v41 = vpop.eup %1328 }
 0x22d   :  { %v1886_v51 = vmul.f32 %v1329_v41, %v1746_v40  ;;  %v1331_v43 = vpop.eup %1330  ;;  %612 = vadd.xlane.f32.xlu2 %v611_v42  ;;  %v386_v40 = vpop.f32.mrf.mxu1 }
 0x22e   :  { %v1891_v45 = vmul.f32 %v1331_v43, %v1730_v25 }
 0x22f   :  { %v472_v44 = vsel %vm437_vm2, %v1886_v51, 0.0 }
 0x230   :  { %473 = vadd.xlane.f32.xlu1 %v472_v44  ;;  %v614_v60 = vsel %vm437_vm2, %v1891_v45, 0.0 }
 0x235   :  { %615 = vadd.xlane.f32.xlu2 %v614_v60 }
 0x239   :  { %v851_v33 = vpop.permute.xlu1 %850 }
 0x23a   :  { %v856_v52 = vadd.f32 %v851_v33, %v386_v40 }
 0x23c   :  { %v860_v54 = vmul.f32 0.2, %v856_v52 }
 0x23e   :  { %v864_v61 = vmax.f32 %v856_v52, %v860_v54 }
 0x240   :  { %v1901_v62 = vadd.f32 %v872_v55, %v864_v61 }
 0x242   :  { %v886_v25 = vsel %vm437_vm2, %v1901_v62, -inf }
 0x243   :  { %887 = vmax.xlane.f32.xlu0 %v886_v25 }
 0x246   :  { %v591_v63 = vpop.xlane.xlu0 %590 }
 0x247   :  { %v597_v2 = vsub.f32 %v1780_v20, %v591_v63 }
 0x249   :  { %v603_v58 = vmul.f32 1.442695, %v597_v2  ;;  %v449_v3 = vpop.xlane.xlu2 %448 }
 0x24a   :  { %v453_v5 = vsub.f32 %v1788_v26, %v449_v3 }
 0x24b   :  { %1332 = vpow2.f32 %v603_v58 }
 0x24c   :  { %v460_v7 = vmul.f32 1.442695, %v453_v5 }
 0x24e   :  { %1334 = vpow2.f32 %v460_v7  ;;  %v879_v10 = vpop.xlane.xlu0 %878 }
 0x251   :  { %v1333_v11 = vpop.eup %1332  ;;  %v734_v15 = vpop.xlane.xlu2 %733 }
 0x252   :  { %v744_v17 = vsub.f32 %v1809_v50, %v734_v15  ;;  %v1909_v18 = vmul.f32 %v1333_v11, %v1764_v1 }
 0x254   :  { %v1335_v57 = vpop.eup %1334  ;;  %v748_v19 = vmul.f32 1.442695, %v744_v17  ;;  %v617_v20 = vsel %vm437_vm2, %v1909_v18, 0.0 }
 0x255   :  { %618 = vadd.xlane.f32.xlu1 %v617_v20  ;;  %v1914_v21 = vmul.f32 %v1335_v57, %v1770_v34 }
 0x256   :  { %1336 = vpow2.f32 %v748_v19  ;;  %v882_v26 = vpop.xlane.xlu0 %881 }
 0x257   :  { %v475_v22 = vsel %vm437_vm2, %v1914_v21, 0.0  ;;  %v890_v50 = vsub.f32 %v1816_v53, %v882_v26  ;;  %v889_v53 = vsub.f32 %v1801_v46, %v879_v10 }
 0x258   :  { %476 = vadd.xlane.f32.xlu0 %v475_v22 }
 0x259   :  { %v737_v28 = vpop.xlane.xlu2 %736  ;;  %v895_v32 = vmul.f32 1.442695, %v890_v50  ;;  %v893_v52 = vmul.f32 1.442695, %v889_v53 }
 0x25a   :  { %v745_v1 = vsub.f32 %v1829_v8, %v737_v28 }
 0x25c   :  { %v1337_v30 = vpop.eup %1336  ;;  %v750_v31 = vmul.f32 1.442695, %v745_v1 }
 0x25d   :  { %v1921_v9 = vmul.f32 %v1337_v30, %v1786_v59 }
 0x25e   :  { %1338 = vpow2.f32 %v750_v31 }
 0x25f   :  { %v760_v34 = vsel %vm437_vm2, %v1921_v9, 0.0  ;;  %1340 = vpow2.f32 %v895_v32 }
 0x260   :  { %761 = vadd.xlane.f32.xlu0 %v760_v34 }
 0x261   :  { %v740_v41 = vpop.xlane.xlu2 %739 }
 0x262   :  { %v746_v42 = vsub.f32 %v1837_v23, %v740_v41 }
 0x264   :  { %v594_v43 = vpop.xlane.xlu1 %593  ;;  %v1339_v44 = vpop.eup %1338  ;;  %v752_v8 = vmul.f32 1.442695, %v746_v42 }
 0x265   :  { %v598_v60 = vsub.f32 %v1839_v27, %v594_v43  ;;  %v1929_v59 = vmul.f32 %v1339_v44, %v1807_v48  ;;  %v1341_v33 = vpop.eup %1340 }
 0x266   :  { %1342 = vpow2.f32 %v752_v8  ;;  %v1934_v23 = vmul.f32 %v1341_v33, %v1796_v38 }
 0x267   :  { %v605_v40 = vmul.f32 1.442695, %v598_v60  ;;  %v763_v49 = vsel %vm437_vm2, %v1929_v59, 0.0 }
 0x268   :  { %764 = vadd.xlane.f32.xlu1 %v763_v49  ;;  %v908_v48 = vsel %vm437_vm2, %v1934_v23, 0.0 }
 0x269   :  { %1344 = vpow2.f32 %v605_v40 }
 0x26a   :  { %1346 = vpow2.f32 %v893_v52 }
 0x26c   :  { %v1343_v54 = vpop.eup %1342 }
 0x26d   :  { %v1937_v46 = vmul.f32 %v1343_v54, %v1821_v4 }
 0x26f   :  { %v1345_v27 = vpop.eup %1344  ;;  %v766_v55 = vsel %vm437_vm2, %v1937_v46, 0.0 }
 0x270   :  { %v1944_v61 = vmul.f32 %v1345_v27, %v1827_v6  ;;  %909 = vadd.xlane.f32.xlu1 %v908_v48  ;;  %767 = vadd.xlane.f32.xlu0 %v766_v55  ;;  %v1347_v25 = vpop.eup %1346 }
 0x271   :  { %v1949_v4 = vmul.f32 %v1347_v25, %v1777_v12 }
 0x272   :  { %v620_v38 = vsel %vm437_vm2, %v1944_v61, 0.0 }
 0x273   :  { %621 = vadd.xlane.f32.xlu2 %v620_v38  ;;  %v905_v63 = vsel %vm437_vm2, %v1949_v4, 0.0 }
 0x27b   :  { %906 = vadd.xlane.f32.xlu2 %v905_v63 }
 0x28a   :  { %v468_v2 = vpop.xlane.xlu1 %467 }
 0x28b   :  { %v478_v58 = vmax.f32 %v468_v2, 1e-30 }
 0x28d   :  { %1348 = vrcp.f32 %v478_v58  ;;  %v885_v3 = vpop.xlane.xlu0 %884 }
 0x28e   :  { %v891_v6 = vsub.f32 %v1859_v0, %v885_v3 }
 0x290   :  { %v897_v5 = vmul.f32 1.442695, %v891_v6 }
 0x292   :  { %1350 = vpow2.f32 %v897_v5 }
 0x293   :  { %v471_v7 = vpop.xlane.xlu1 %470  ;;  %v1349_v10 = vpop.eup %1348 }
 0x294   :  { %v479_v11 = vmax.f32 %v471_v7, 1e-30  ;;  %v486_v15 = vmul.f32 %v1349_v10, %v1854_v14 }
 0x296   :  { %1352 = vrcp.f32 %v479_v11  ;;  %1253 = vmatmul.msk.f32.vlgmr.msra.gmra.mxu2 %vm437_vm2, %v486_v15 }
 0x298   :  { %v1351_v12 = vpop.eup %1350  ;;  %v743_v17 = vpop.xlane.xlu2 %742 }
 0x299   :  { %v747_v57 = vsub.f32 %v1876_v56, %v743_v17  ;;  %v1958_v19 = vmul.f32 %v1351_v12, %v1849_v39 }
 0x29b   :  { %v754_v26 = vmul.f32 1.442695, %v747_v57  ;;  %v911_v0 = vsel %vm437_vm2, %v1958_v19, 0.0 }
 0x29c   :  { %v1353_v20 = vpop.eup %1352  ;;  %912 = vadd.xlane.f32.xlu0 %v911_v0 }
 0x29d   :  { %v487_v22 = vmul.f32 %v1353_v20, %v1870_v13  ;;  %1354 = vpow2.f32 %v754_v26 }
 0x29f   :  { %1254 = vmatmul.msk.f32.gmra.mxu2 %vm437_vm2, %v487_v22 }
 0x2a0   :  { %v613_v14 = vpop.xlane.xlu2 %612 }
 0x2a1   :  { %v623_v28 = vmax.f32 %v613_v14, 1e-30 }
 0x2a3   :  { %v474_v50 = vpop.xlane.xlu1 %473  ;;  %v1355_v1 = vpop.eup %1354  ;;  %1356 = vrcp.f32 %v623_v28 }
 0x2a4   :  { %v480_v56 = vmax.f32 %v474_v50, 1e-30  ;;  %v1965_v39 = vmul.f32 %v1355_v1, %v1864_v35 }
 0x2a6   :  { %1358 = vrcp.f32 %v480_v56  ;;  %v769_v30 = vsel %vm437_vm2, %v1965_v39, 0.0  ;;  %v981_v56 = vld [vmem:[%s2126_s14 + $0x18] sm:$0xff] }
 0x2a7   :  { %770 = vadd.xlane.f32.xlu2 %v769_v30  ;;  %1010 = vmatpush.msra.mxu0 %v981_v56  ;;  %v979_v30 = vld [vmem:[%s2126_s14 + $0x8] sm:$0xff] }
 0x2a8   :  { %v616_v31 = vpop.xlane.xlu2 %615 }
 0x2a9   :  { %v1357_v32 = vpop.eup %1356  ;;  %v624_v13 = vmax.f32 %v616_v31, 1e-30 }
 0x2aa   :  { %v631_v34 = vmul.f32 %v1357_v32, %v1881_v37 }
 0x2ab   :  { %1360 = vrcp.f32 %v624_v13 }
 0x2ac   :  { %v1359_v41 = vpop.eup %1358  ;;  %1261 = vmatmul.msk.f32.vlgmr.msrb.gmra.mxu3 %vm437_vm2, %v631_v34 }
 0x2ad   :  { %v488_v42 = vmul.f32 %v1359_v41, %v1886_v51 }
 0x2af   :  { %1255 = vmatmul.msk.f32.gmra.mxu2 %vm437_vm2, %v488_v42 }
 0x2b1   :  { %v1361_v35 = vpop.eup %1360 }
 0x2b2   :  { %v632_v43 = vmul.f32 %v1361_v35, %v1891_v45 }
 0x2b4   :  { %1262 = vmatmul.msk.f32.gmra.mxu3 %vm437_vm2, %v632_v43 }
 0x2b6   :  { %v888_v44 = vpop.xlane.xlu0 %887 }
 0x2b7   :  { %v892_v53 = vsub.f32 %v1901_v62, %v888_v44 }
 0x2b9   :  { %v899_v8 = vmul.f32 1.442695, %v892_v53 }
 0x2bb   :  { %1362 = vpow2.f32 %v899_v8 }
 0x2c1   :  { %v1363_v60 = vpop.eup %1362 }
 0x2c2   :  { %v1977_v37 = vmul.f32 %v1363_v60, %v1898_v47 }
 0x2c4   :  { %v914_v40 = vsel %vm437_vm2, %v1977_v37, 0.0 }
 0x2c5   :  { %915 = vadd.xlane.f32.xlu1 %v914_v40 }
 0x2c8   :  { %v619_v51 = vpop.xlane.xlu1 %618 }
 0x2c9   :  { %v625_v49 = vmax.f32 %v619_v51, 1e-30 }
 0x2cb   :  { %1364 = vrcp.f32 %v625_v49  ;;  %v477_v33 = vpop.xlane.xlu0 %476 }
 0x2cc   :  { %v481_v45 = vmax.f32 %v477_v33, 1e-30 }
 0x2ce   :  { %1366 = vrcp.f32 %v481_v45 }
 0x2d1   :  { %v1365_v52 = vpop.eup %1364 }
 0x2d2   :  { %v633_v54 = vmul.f32 %v1365_v52, %v1909_v18 }
 0x2d3   :  { %v762_v62 = vpop.xlane.xlu0 %761 }
 0x2d4   :  { %v1367_v27 = vpop.eup %1366  ;;  %v772_v48 = vmax.f32 %v762_v62, 1e-30  ;;  %1263 = vmatmul.msk.f32.gmra.mxu3 %vm437_vm2, %v633_v54 }
 0x2d5   :  { %v489_v47 = vmul.f32 %v1367_v27, %v1914_v21 }
 0x2d6   :  { %1368 = vrcp.f32 %v772_v48 }
 0x2d7   :  { %1256 = vmatmul.msk.f32.gmra.mxu2 %vm437_vm2, %v489_v47 }
 0x2db   :  { %v765_v55 = vpop.xlane.xlu1 %764 }
 0x2dc   :  { %v1369_v38 = vpop.eup %1368  ;;  %v773_v25 = vmax.f32 %v765_v55, 1e-30 }
 0x2dd   :  { %v780_v63 = vmul.f32 %v1369_v38, %v1921_v9 }
 0x2de   :  { %1370 = vrcp.f32 %v773_v25 }
 0x2df   :  { %1269 = vmatmul.msk.f32.vlgmr.msrb.gmra.mxu2 %vm437_vm2, %v780_v63 }
 0x2e3   :  { %v768_v2 = vpop.xlane.xlu0 %767  ;;  %v910_v15 = vpop.xlane.xlu1 %909 }
 0x2e4   :  { %v1371_v18 = vpop.eup %1370  ;;  %v774_v58 = vmax.f32 %v768_v2, 1e-30 }
 0x2e5   :  { %v781_v6 = vmul.f32 %v1371_v18, %v1929_v59  ;;  %v918_v59 = vmax.f32 %v910_v15, 1e-30 }
 0x2e6   :  { %v622_v3 = vpop.xlane.xlu2 %621  ;;  %1372 = vrcp.f32 %v774_v58 }
 0x2e7   :  { %v626_v5 = vmax.f32 %v622_v3, 1e-30  ;;  %1270 = vmatmul.msk.f32.gmra.mxu2 %vm437_vm2, %v781_v6 }
 0x2e9   :  { %1374 = vrcp.f32 %v626_v5 }
 0x2ec   :  { %v1373_v21 = vpop.eup %1372 }
 0x2ed   :  { %v782_v9 = vmul.f32 %v1373_v21, %v1937_v46 }
 0x2ee   :  { %v907_v7 = vpop.xlane.xlu2 %906 }
 0x2ef   :  { %v1375_v10 = vpop.eup %1374  ;;  %v917_v11 = vmax.f32 %v907_v7, 1e-30  ;;  %1271 = vmatmul.msk.f32.gmra.mxu2 %vm437_vm2, %v782_v9 }
 0x2f0   :  { %v634_v12 = vmul.f32 %v1375_v10, %v1944_v61 }
 0x2f1   :  { %1376 = vrcp.f32 %v917_v11 }
 0x2f2   :  { %1264 = vmatmul.msk.f32.gmra.mxu3 %vm437_vm2, %v634_v12  ;;  %1378 = vrcp.f32 %v918_v59 }
 0x2f7   :  { %v1377_v17 = vpop.eup %1376 }
 0x2f8   :  { %v925_v57 = vmul.f32 %v1377_v17, %v1949_v4  ;;  %v1379_v20 = vpop.eup %1378 }
 0x2f9   :  { %v926_v26 = vmul.f32 %v1379_v20, %v1934_v23 }
 0x2fa   :  { %1277 = vmatmul.msk.f32.vlgmr.msra.gmra.mxu3 %vm437_vm2, %v925_v57 }
 0x302   :  { %1278 = vmatmul.msk.f32.gmra.mxu3 %vm437_vm2, %v926_v26 }
 0x30f   :  { %v913_v46 = vpop.xlane.xlu0 %912 }
 0x310   :  { %v919_v0 = vmax.f32 %v913_v46, 1e-30 }
 0x312   :  { %1380 = vrcp.f32 %v919_v0 }
 0x318   :  { %v1381_v61 = vpop.eup %1380 }
 0x319   :  { %v927_v22 = vmul.f32 %v1381_v61, %v1958_v19  ;;  %v980_v19 = vld [vmem:[%s2126_s14 + $0x10] sm:$0xff]  ;;  %v519_v32 = vpop.f32.mrf.mxu2 }
 0x31a   :  { %v771_v14 = vpop.xlane.xlu2 %770  ;;  %1011 = vmatpush.msra.mxu0 %v980_v19  ;;  %v531_v35 = vmul.f32 %v519_v32, %v1600_v16 }
 0x31b   :  { %v775_v28 = vmax.f32 %v771_v14, 1e-30  ;;  %1279 = vmatmul.msk.f32.gmra.mxu3 %vm437_vm2, %v927_v22 }
 0x31c   :  { %1012 = vmatpush.msra.mxu0 %v979_v30  ;;  %v1031_v30 = vld [vmem:[%s2129_s17] sm:$0xf]  ;;  %s1209_s17 = sshll.u32 %s2134_s22, 4  ;;  %s1210_s17 = int_to_ptr.hbm [resolvable:$true] %s1209_s17 }
 0x31d   :  { %1382 = vrcp.f32 %v775_v28 }
 0x322   :  { %v522_v34 = vpop.f32.mrf.mxu2 }
 0x323   :  { %v1383_v50 = vpop.eup %1382  ;;  %v532_v42 = vmul.f32 %v522_v34, %v1612_v24 }
 0x324   :  { %v783_v4 = vmul.f32 %v1383_v50, %v1965_v39  ;;  %v978_v39 = vld [vmem:[%s2126_s14] sm:$0xff] }
 0x325   :  { %1013 = vmatpush.msra.mxu0 %v978_v39  ;;  %v533_v44 = vadd.f32 %v532_v42, %v531_v35 }
 0x326   :  { %1272 = vmatmul.msk.f32.gmra.mxu2 %vm437_vm2, %v783_v4 }
 0x32f   :  { %v664_v53 = vpop.f32.mrf.mxu3 }
 0x330   :  { %v676_v52 = vmul.f32 %v664_v53, %v1600_v16 }
 0x332   :  { %v525_v41 = vpop.f32.mrf.mxu2 }
 0x333   :  { %v534_v43 = vmul.f32 %v525_v41, %v1627_v29 }
 0x335   :  { %v535_v60 = vadd.f32 %v534_v43, %v533_v44 }
 0x337   :  { %v667_v49 = vpop.f32.mrf.mxu3 }
 0x338   :  { %v916_v1 = vpop.xlane.xlu1 %915  ;;  %v677_v45 = vmul.f32 %v667_v49, %v1612_v24 }
 0x339   :  { %v920_v23 = vmax.f32 %v916_v1, 1e-30 }
 0x33a   :  { %v678_v62 = vadd.f32 %v677_v45, %v676_v52 }
 0x33b   :  { %1384 = vrcp.f32 %v920_v23 }
 0x341   :  { %v1385_v31 = vpop.eup %1384 }
 0x342   :  { %v928_v13 = vmul.f32 %v1385_v31, %v1977_v37  ;;  %v1319_v31 = vld [vmem:[%s2154_s6] ss:$0 sm:$0xff] }
 0x344   :  { %1280 = vmatmul.msk.f32.gmra.mxu3 %vm437_vm2, %v928_v13 }
 0x357   :  { %v670_v33 = vpop.f32.mrf.mxu3 }
 0x358   :  { %v679_v54 = vmul.f32 %v670_v33, %v1627_v29 }
 0x35a   :  { %v528_v8 = vpop.f32.mrf.mxu2  ;;  %v680_v48 = vadd.f32 %v679_v54, %v678_v62 }
 0x35b   :  { %v536_v40 = vmul.f32 %v528_v8, %v1642_v36 }
 0x35d   :  { %v2019_v51 = vadd.f32 %v536_v40, %v535_v60 }
 0x35f   :  { %v538_v37 = vmax.f32 %v2019_v51, 0.0  ;;  %v1400_v51 = vld [vmem:[%s2149_s25] sm:$0xff] }
 0x361   :  { %1281 = vmatmul.msk.f32.vlgmr.msra.gmra.mxu0 %vm150_vm1, %v538_v37 }
 0x362   :  { %v813_v25 = vpop.f32.mrf.mxu2 }
 0x363   :  { %v825_v58 = vmul.f32 %v813_v25, %v1600_v16 }
 0x36a   :  { %v816_v63 = vpop.f32.mrf.mxu2 }
 0x36b   :  { %v826_v18 = vmul.f32 %v816_v63, %v1612_v24 }
 0x36d   :  { %v827_v6 = vadd.f32 %v826_v18, %v825_v58 }
 0x372   :  { %v819_v2 = vpop.f32.mrf.mxu2 }
 0x373   :  { %v828_v3 = vmul.f32 %v819_v2, %v1627_v29 }
 0x375   :  { %v673_v27 = vpop.f32.mrf.mxu3  ;;  %v829_v21 = vadd.f32 %v828_v3, %v827_v6 }
 0x376   :  { %v681_v47 = vmul.f32 %v673_v27, %v1642_v36 }
 0x378   :  { %v2029_v55 = vadd.f32 %v681_v47, %v680_v48 }
 0x37a   :  { %v683_v38 = vmax.f32 %v2029_v55, 0.0 }
 0x37c   :  { %1282 = vmatmul.msk.f32.gmra.mxu0 %vm150_vm1, %v683_v38 }
 0x37d   :  { %v958_v10 = vpop.f32.mrf.mxu3 }
 0x37e   :  { %v970_v17 = vmul.f32 %v958_v10, %v1600_v16  ;;  %v1318_v16 = vld [vmem:[%s2127_s15] ss:$0 sm:$0xff]  ;;  %v1126_v10 = vld [vmem:[%s2130_s18 + $0x18] sm:$0xff]  ;;  %s1432_s15 = smov [#allocation2]  }
 0x37f   :  { %s1207_s8 = sshll.u32 %s1432_s15, 4  ;;  %s1208_s8 = int_to_ptr.vmem [resolvable:$true] %s1207_s8 }
 0x385   :  { %v961_v15 = vpop.f32.mrf.mxu3 }
 0x386   :  { %v971_v59 = vmul.f32 %v961_v15, %v1612_v24  ;;  %v1125_v15 = vld [vmem:[%s2130_s18 + $0x10] sm:$0xff] }
 0x388   :  { %v972_v20 = vadd.f32 %v971_v59, %v970_v17  ;;  %v1123_v59 = vld [vmem:[%s2130_s18] sm:$0xff]  ;;  %v1161_v17 = vld [vmem:[%s2132_s20 + $0x8] sm:$0xff] }
 0x39e   :  { %v964_v12 = vpop.f32.mrf.mxu3 }
 0x39f   :  { %v973_v57 = vmul.f32 %v964_v12, %v1627_v29  ;;  %v1124_v12 = vld [vmem:[%s2130_s18 + $0x8] sm:$0xff] }
 0x3a1   :  { %v974_v46 = vadd.f32 %v973_v57, %v972_v20  ;;  %v1160_v57 = vld [vmem:[%s2132_s20] sm:$0xff] }
 0x3a9   :  { %v822_v5 = vpop.f32.mrf.mxu2 }
 0x3aa   :  { %v830_v7 = vmul.f32 %v822_v5, %v1642_v36 }
 0x3ac   :  { %v2039_v11 = vadd.f32 %v830_v7, %v829_v21 }
 0x3ae   :  { %v832_v9 = vmax.f32 %v2039_v11, 0.0 }
 0x3b0   :  { %1283 = vmatmul.msk.f32.gmra.mxu0 %vm150_vm1, %v832_v9 }
 0x3c7   :  { %v967_v26 = vpop.f32.mrf.mxu3 }
 0x3c8   :  { %v975_v0 = vmul.f32 %v967_v26, %v1642_v36 }
 0x3ca   :  { %v2049_v61 = vadd.f32 %v975_v0, %v974_v46 }
 0x3cc   :  { %v977_v22 = vmax.f32 %v2049_v61, 0.0  ;;  %v1321_v61 = vld [vmem:[%s2133_s21] ss:$0 sm:$0xff] }
 0x3ce   :  { %1284 = vmatmul.msk.f32.gmra.mxu0 %vm150_vm1, %v977_v22 }
 0x3de   :  { %v1015_v14 = vpop.f32.mrf.mxu0 }
 0x3df   :  { %v1016_v36 = vadd.f32 %v1318_v16, %v1015_v14 }
 0x3f9   :  { %v1018_v28 = vpop.f32.mrf.mxu0 }
 0x3fa   :  { %v1019_v1 = vadd.f32 %v1318_v16, %v1018_v28 }
 0x42d   :  { %v1021_v24 = vpop.f32.mrf.mxu0 }
 0x42e   :  { %v1022_v50 = vadd.f32 %v1318_v16, %v1021_v24 }
 0x44b   :  { %v1024_v29 = vpop.f32.mrf.mxu0 }
 0x44c   :  { %v1025_v4 = vadd.f32 %v1318_v16, %v1024_v29 }
 0x44e   :  { %1386 = vtanh.f32 %v1025_v4 }
 0x44f   :  { %1388 = vtanh.f32 %v1022_v50 }
 0x450   :  { %1390 = vtanh.f32 %v1019_v1 }
 0x451   :  { %1392 = vtanh.f32 %v1016_v36 }
 0x454   :  { %v1387_v23 = vpop.eup %1386 }
 0x455   :  { %1047 = vmatpush.msrb.mxu1 %v1387_v23  ;;  %v1389_v56 = vpop.eup %1388 }
 0x456   :  { %v1391_v19 = vpop.eup %1390 }
 0x457   :  { %1048 = vmatpush.msrb.mxu1 %v1389_v56  ;;  %v1393_v39 = vpop.eup %1392 }
 0x459   :  { %1049 = vmatpush.msrb.mxu1 %v1391_v19 }
 0x45b   :  { %1050 = vmatpush.msrb.mxu1 %v1393_v39 }
 0x45c   :  { %1285 = vmatmul.msk.f32.vlgmr.msrb.gmra.mxu1 %vm150_vm1, %v1031_v30 }
 0x45d   :  { %1149 = vmatpush.msra.mxu1 %v1126_v10 }
 0x45f   :  { %1150 = vmatpush.msra.mxu1 %v1125_v15 }
 0x461   :  { %1151 = vmatpush.msra.mxu1 %v1124_v12 }
 0x463   :  { %1152 = vmatpush.msra.mxu1 %v1123_v59 }
 0x465   :  { %1180 = vmatpush.msrb.mxu1 %v1161_v17 }
 0x467   :  { %1181 = vmatpush.msrb.mxu1 %v1160_v57 }
 0x4d9   :  { %v1052_v32 = vpop.f32.mrf.mxu1 }
 0x4da   :  { %v1059_v13 = vmul.f32 %v1319_v31, %v1052_v32 }
 0x4dc   :  { %v1061_v34 = vsel %vm1060_vm3, %v1059_v13, 0.0 }
 0x4dd   :  { %1062 = vadd.xlane.f32.xlu2 %v1061_v34 }
 0x550   :  { %v1063_v41 = vpop.xlane.xlu2 %1062 }
 0x551   :  { %v1065_v42 = vrot.slane %v1063_v41, 1 }
 0x553   :  { %v1067_v35 = vmax.f32 %v1063_v41, %v1065_v42 }
 0x555   :  { %v1068_v43 = vsub.f32 %v1063_v41, %v1067_v35  ;;  %v1072_v44 = vrot.slane %v1067_v35, 7 }
 0x557   :  { %v1074_v53 = vsub.f32 %v1063_v41, %v1072_v44  ;;  %v1069_v8 = vmul.f32 1.442695, %v1068_v43 }
 0x559   :  { %v1075_v60 = vmul.f32 1.442695, %v1074_v53 }
 0x55b   :  { %1394 = vpow2.f32 %v1075_v60 }
 0x55c   :  { %1396 = vpow2.f32 %v1069_v8 }
 0x561   :  { %v1395_v40 = vpop.eup %1394 }
 0x562   :  { %v1078_v49 = vrot.slane %v1395_v40, 1  ;;  %v1397_v33 = vpop.eup %1396 }
 0x564   :  { %v1080_v45 = vadd.f32 %v1397_v33, %v1078_v49 }
 0x566   :  { %1398 = vrcp.f32 %v1080_v45  ;;  %v1092_v27 = vand.u32 2147483648, %v1080_v45  ;;  %v1090_v47 = vand.u32 2147483647, %v1080_v45  ;;  %vm1086_vm5 = vweird.f32 %v1080_v45 }
 0x568   :  { %v1093_v63 = vor.u32 1.1754944e-38, %v1092_v27  ;;  %vm1091_vm7 = vcmp.eq.f32.partialorder %v1090_v47, 8.507059e+37 }
 0x56c   :  { %v1399_v52 = vpop.eup %1398 }
 0x56d   :  { %v1082_v54 = vmul.f32 %v1399_v52, %v1080_v45  ;;  %vm1087_vm4 = vweird.f32 %v1399_v52 }
 0x56e   :  { %vm1088_vm6 = vmor %vm1086_vm5, %vm1087_vm4 }
 0x56f   :  { %v1083_v62 = vsub.f32 1.0, %v1082_v54 }
 0x571   :  { %v1084_v48 = vmul.f32 %v1399_v52, %v1083_v62 }
 0x573   :  { %v1085_v25 = vadd.f32 %v1399_v52, %v1084_v48 }
 0x575   :  { %v1089_v2 = vsel %vm1088_vm6, %v1399_v52, %v1085_v25 }
 0x576   :  { %v1094_v18 = vsel %vm1091_vm7, %v1093_v63, %v1089_v2 }
 0x577   :  { %v1095_v58 = vmul.f32 %v1397_v33, %v1094_v18  ;;  %v1102_v3 = vrot.slane %v1094_v18, 7 }
 0x579   :  { %1290 = vpush %v1095_v58  ;;  %v1104_v6 = vmul.f32 %v1395_v40, %v1102_v3  ;;  %v1112_v7 = vrot.slane %v1095_v58, 2 }
 0x57b   :  { %v1106_v5 = vrot.slane %v1104_v6, 1  ;;  %v1117_v21 = vrot.slane %v1104_v6, 3 }
 0x57d   :  { %1292 = vpush %v1106_v5 }
 0x57e   :  { %1294 = vpush %v1112_v7 }
 0x57f   :  { %1296 = vpush %v1117_v21 }
 0x5aa   :  { %s1291_s16 = spop %1290 }
 0x5ab   :  { %v1098_v20 = vstv %s1291_s16 }
 0x5ac   :  { %v1100_v46 = vmul.f32 %v1098_v20, %v538_v37  ;;  %v1401_v37 = vld [vmem:[%s2149_s25 + $0x8] sm:$0xff]  ;;  %s1430_s25 = smov 16  }
 0x5ae   :  { %s1293_s4 = spop %1292 }
 0x5af   :  { %v1108_v26 = vstv %s1293_s4  ;;  %s1295_s0 = spop %1294 }
 0x5b0   :  { %v1110_v0 = vmul.f32 %v1108_v26, %v683_v38  ;;  %s1297_s18 = spop %1296  ;;  %v1114_v28 = vstv %s1295_s0  ;;  %v1320_v38 = vld [vmem:[%s2131_s19] ss:$0 sm:$0xff]  ;;  %s1431_s19 = smov 112  }
 0x5b1   :  { %v1119_v24 = vstv %s1297_s18  ;;  %v1116_v16 = vmul.f32 %v1114_v28, %v832_v9 }
 0x5b2   :  { %v1111_v14 = vadd.f32 %v1110_v0, %v1100_v46  ;;  %v1121_v29 = vmul.f32 %v1119_v24, %v977_v22 }
 0x5b4   :  { %1286 = vmatmul.msk.f32.vlgmr.msra.gmra.mxu1 %vm150_vm1, %v1111_v14  ;;  %v1122_v50 = vadd.f32 %v1121_v29, %v1116_v16 }
 0x5bc   :  { %1287 = vmatmul.msk.f32.gmra.mxu1 %vm150_vm1, %v1122_v50 }
 0x5c4   :  { %1288 = vmatmul.msk.f32.vlgmr.msrb.gmra.mxu1 %vm80_vm0, %v1400_v51 }
 0x5cc   :  { %1289 = vmatmul.msk.f32.gmra.mxu1 %vm80_vm0, %v1401_v37 }
 0x631   :  { %v1154_v55 = vpop.f32.mrf.mxu1 }
 0x632   :  { %v1155_v1 = vadd.f32 %v1320_v38, %v1154_v55 }
 0x639   :  { %v1157_v11 = vpop.f32.mrf.mxu1 }
 0x63a   :  { %v1158_v9 = vadd.f32 %v1320_v38, %v1157_v11 }
 0x641   :  { %v1183_v22 = vpop.f32.mrf.mxu1 }
 0x642   :  { %v1184_v4 = vadd.f32 %v1321_v61, %v1183_v22 }
 0x644   :  { %v1189_v36 = vmax.f32 %v1184_v4, 0.0 }
 0x646   :  { %v1191_v23 = vadd.f32 %v1189_v36, %v1155_v1 }
 0x648   :  { %1192 = vst.msk [vmem:[#allocation2] sm:$0xff] %vm80_vm0, %v1191_v23 }
 0x649   :  { %v1186_v56 = vpop.f32.mrf.mxu1 }
 0x64a   :  { %v1187_v19 = vadd.f32 %v1321_v61, %v1186_v56 }
 0x64c   :  { %v1190_v30 = vmax.f32 %v1187_v19, 0.0 }
 0x64e   :  { %1194 = vrot.lane.b32.xlu0 %v1190_v30, %s1430_s25 }
 0x6c0   :  { %v1195_v39 = vpop.permute.xlu0 %1194 }
 0x6c1   :  { %v1197_v31 = vadd.f32 %v1195_v39, %v1158_v9 }
 0x6c3   :  { %1199 = vrot.lane.b32.xlu1 %v1197_v31, %s1431_s19 }
 0x735   :  { %v1200_v32 = vpop.permute.xlu1 %1199 }
 0x736   :  { %1202 = vst.msk [vmem:[#allocation2 + $0x8] sm:$0xff] %vm80_vm0, %v1200_v32 }
 0x737   :  { %1215 = dma.vmem_to_hbm [thread:$0]  %s1208_s8, 256, %s1210_s17, [#allocation3], %s1433_s26, %s1433_s26, %s1434_s2  }
 0x738   :  { %1426 = dma.done.wait [#allocation3], 256  }
 0x739   :  { %1427 = vsyncadd [#allocation3], 4294967040 }
 0x73a   :  { %1220 = vsyncpa [#allocation3], 1 }

</bundles_post_ra>
